<compile_context>
chip_gen: v7x
topology: tpu7x:2x2x1
jax: 0.10.0
libtpu: 0.0.40
codegen_flags: <defaults>
</compile_context>

<pallas_src>
import functools

import jax
import jax.numpy as jnp
from jax import lax
from jax.experimental import pallas as pl
from jax.experimental.pallas import tpu as pltpu

K = 1.0            # curvature
SQRT_K = 1.0
BN_EPS = 1e-5      # self.eps in the module
CENTROID_EPS = 1e-8
NORM_EPS = 1e-8
ACOSH_EPS = 1e-15

_FUSED_VMEM_BUDGET = 24 * 1024 * 1024   # conservative gate for the single-pass resident path


# ---------------------------------------------------------------------------
# shared math helpers (work on (..., D, n) tiles: D on sublanes, n on lanes)
# ---------------------------------------------------------------------------
def _round_up(x, m):
    return ((x + m - 1) // m) * m


def _linner(u, v):
    """Lorentz inner product reduced over the feature (sublane) axis, keepdims."""
    return jnp.sum(u * v, axis=-2, keepdims=True) - 2.0 * u[..., 0:1, :] * v[..., 0:1, :]


def _dist_from_inner(inner_mx):
    """dist(mean, x) = sqrt(k) * arccosh(-<mean,x>_L / k), geoopt-style clamps."""
    d = jnp.maximum(-inner_mx / K, 1.0)
    z = jnp.sqrt(jnp.maximum(d * d - 1.0, ACOSH_EPS))
    return SQRT_K * jnp.log(d + z)


def _centroid_normalize(ave):
    """geoopt centroid normalization of (..., D, 1) vectors."""
    inner = jnp.sum(ave * ave, axis=-2, keepdims=True) - 2.0 * ave[..., 0:1, :] ** 2
    return SQRT_K * ave / jnp.sqrt(jnp.maximum(jnp.abs(inner), CENTROID_EPS))


def _normalize_tile(x, mu, trp_vec, beta, tp0_vec, scale):
    """logmap(mean,.) -> transp0back(mean,.) -> *scale -> transp0(beta,.) -> expmap(beta,.)."""
    inner_mx = _linner(mu, x)                                   # <mean, x>_L
    dist = _dist_from_inner(inner_mx)
    nomin = x + (inner_mx / K) * mu                             # logmap numerator
    nsq = jnp.maximum(_linner(nomin, nomin), NORM_EPS)
    # scale (gamma/(var+eps)) folded into the logmap factor: parallel transport is linear.
    fac = dist * scale * lax.rsqrt(nsq)
    u = fac * nomin
    v = u - u[..., 0:1, :] * trp_vec                            # transp0back(mean, u)
    w = v + _linner(beta, v) * tp0_vec                          # transp0(beta, v)
    wsq = jnp.maximum(_linner(w, w), NORM_EPS)
    wn = jnp.sqrt(wsq)
    e_pos = jnp.exp(wn / SQRT_K)
    e_neg = jnp.exp(-wn / SQRT_K)                               # exact, not approx reciprocal
    cosh = 0.5 * (e_pos + e_neg)
    sinh = 0.5 * (e_pos - e_neg)
    return cosh * beta + (SQRT_K * sinh * lax.rsqrt(wsq)) * w   # expmap_beta(w)


def _group_time(y, g, cm1):
    """Per-group time of lorentz_split_batch: t_g = sqrt(||space_g||^2 + k); single store."""
    sq = y * y                                                  # hoisted square
    sums = [jnp.sum(sq[..., 1 + i * cm1:1 + (i + 1) * cm1, :], axis=-2, keepdims=True)
            for i in range(g)]
    return jnp.sqrt(jnp.concatenate(sums, axis=-2) + K)


# ---------------------------------------------------------------------------
# pass 1: per-(batch, n_outer) partial sums over N   (feeds two-level centroid)
# ---------------------------------------------------------------------------
def _batch_sum_kernel(x_ref, sum_ref):
    @pl.when(pl.program_id(2) == 0)
    def _():
        sum_ref[...] = jnp.zeros_like(sum_ref)

    sum_ref[...] += jnp.sum(x_ref[...], axis=-1, keepdims=True)       # (1, D, 1)


# ---------------------------------------------------------------------------
# pass 2: Frechet variance via  ||transp0back(mean, logmap(mean, x))||_2 == dist(mean, x)
# ---------------------------------------------------------------------------
def _variance_kernel(x_ref, mean_ref, nsum_ref, *, n_valid, tn, n_inner, mask_pad):
    @pl.when(pl.program_id(2) == 0)
    def _():
        nsum_ref[...] = jnp.zeros_like(nsum_ref)

    dist = _dist_from_inner(_linner(mean_ref[...], x_ref[...]))       # (1, 1, tn)
    if mask_pad:  # static: only emitted when N was padded
        start = (pl.program_id(1) * n_inner + pl.program_id(2)) * tn
        lane = lax.broadcasted_iota(jnp.int32, dist.shape, 2)
        dist = jnp.where(lane + start < n_valid, dist, 0.0)
    nsum_ref[...] += jnp.sum(dist, axis=-1, keepdims=True)            # (1, 1, 1)


# ---------------------------------------------------------------------------
# pass 3: fused normalize + expmap(beta) + per-group time
# ---------------------------------------------------------------------------
def _normalize_kernel(x_ref, c_ref, y_ref, tg_ref, *, g, cm1):
    c = c_ref[...]                                                    # packed constants (1, D, 8)
    mu, trp, beta, tp0 = c[:, :, 0:1], c[:, :, 1:2], c[:, :, 2:3], c[:, :, 3:4]
    scale = c[:, 0:1, 4:5]                                            # (1, 1, 1)
    y = _normalize_tile(x_ref[...], mu, trp, beta, tp0, scale)
    y_ref[...] = y
    tg_ref[...] = _group_time(y, g, cm1)


# ---------------------------------------------------------------------------
# single-pass fully VMEM-resident kernel (small / medium tensors): 1 read + 1 write of x
# ---------------------------------------------------------------------------
def _fused_kernel(x_ref, beta_ref, gamma_ref, y_ref, tg_ref, *, g, cm1, n_valid):
    bs, D, n_pad = x_ref.shape
    x = x_ref[...]                                                    # whole tensor resident

    # two-level centroid (per batch over N, then over the batch)
    cent = _centroid_normalize(jnp.sum(x, axis=-1, keepdims=True) / jnp.float32(n_valid))
    mean = _centroid_normalize(jnp.sum(cent, axis=0, keepdims=True) / jnp.float32(bs))  # (1, D, 1)

    # Frechet variance via the dist identity
    dist = _dist_from_inner(_linner(mean, x))                         # (bs, 1, n_pad)
    if n_pad != n_valid:
        lane = lax.broadcasted_iota(jnp.int32, dist.shape, 2)
        dist = jnp.where(lane < n_valid, dist, 0.0)
    dsum = jnp.sum(jnp.sum(dist, axis=-1, keepdims=True), axis=0, keepdims=True)   # (1, 1, 1)
    var = dsum[0] / jnp.float32(bs * n_valid)                         # (1, 1)
    scale = gamma_ref[0] / (var + BN_EPS)                             # (1, 1)

    # origin-dependent constant vectors
    beta = beta_ref[...]                                              # (1, D, 1)
    row = lax.broadcasted_iota(jnp.int32, (1, D, 1), 1)
    origin = jnp.where(row == 0, SQRT_K, 0.0)
    trp = (mean + origin) / (SQRT_K + mean[:, 0:1, :])                # transp0back constant
    tp0 = (origin + beta) / (K + SQRT_K * beta[:, 0:1, :])            # transp0 constant
    mu2, trp2, beta2, tp02 = mean[0], trp[0], beta[0], tp0[0]         # (D, 1) each

    # normalize + expmap per batch (bounds per-iteration temporaries to one batch slice)
    @pl.loop(0, bs)
    def _(b):
        yb = _normalize_tile(x_ref[b], mu2, trp2, beta2, tp02, scale)
        y_ref[b] = yb
        tg_ref[b] = _group_time(yb, g, cm1)


# ---------------------------------------------------------------------------
# tiling selection: lane-dense, >= 1024-lane tiles where possible, always a 128 multiple
# ---------------------------------------------------------------------------
def _choose_tiling(n):
    n128 = _round_up(n, 128)
    best = 128
    for tn in (4096, 2048, 1024, 512, 256, 128):
        if n128 % tn == 0:
            best = tn
            break
    if best >= 1024 or n128 <= 8 * 1024:
        return best, n128
    # large N whose 128-padded length only divides into small tiles: pad a little further
    n_pad = _round_up(n128, 1024)
    for tn in (4096, 2048, 1024):
        if n_pad % tn == 0:
            return tn, n_pad
    return 1024, n_pad


# ---------------------------------------------------------------------------
# driver: 3-pass tiled path
# ---------------------------------------------------------------------------
def _lorentz_batchnorm_multipass(x_dn, beta, gamma, g, n_valid, tn):
    bs, D, n_pad = x_dn.shape
    cm1 = (D - 1) // g
    nt = n_pad // tn

    # small outer split of the N-tiles so v7x's two TensorCores share the reduction passes
    n_outer = 1
    for cand in (2, 3, 4):
        if nt >= cand and nt % cand == 0:
            n_outer = cand
            break
    n_inner = nt // n_outer

    reduce_params = pltpu.CompilerParams(
        dimension_semantics=("parallel", "parallel", "arbitrary"))
    par_params = pltpu.CompilerParams(
        dimension_semantics=("parallel", "parallel"))

    x_spec3 = pl.BlockSpec((1, D, tn), lambda b, no, ni: (b, 0, no * n_inner + ni))

    # ---- pass 1: per-(b, n_outer) partial sums over N ---------------------------------------
    xsum_part = pl.pallas_call(
        _batch_sum_kernel,
        out_shape=jax.ShapeDtypeStruct((bs * n_outer, D, 1), jnp.float32),
        grid=(bs, n_outer, n_inner),
        in_specs=[x_spec3],
        out_specs=pl.BlockSpec((1, D, 1), lambda b, no, ni: (b * n_outer + no, 0, 0)),
        compiler_params=reduce_params,
    )(x_dn)

    xsum = jnp.sum(xsum_part.reshape(bs, n_outer, D, 1), axis=1)            # (bs, D, 1)
    cent = _centroid_normalize(xsum / jnp.float32(n_valid))
    mean = _centroid_normalize(jnp.sum(cent, axis=0, keepdims=True) / jnp.float32(bs))  # (1, D, 1)

    # ---- pass 2: Frechet variance  var = mean_{b,n} dist(mean, x) ----------------------------
    nsum_part = pl.pallas_call(
        functools.partial(_variance_kernel, n_valid=n_valid, tn=tn,
                          n_inner=n_inner, mask_pad=(n_pad != n_valid)),
        out_shape=jax.ShapeDtypeStruct((bs * n_outer, 1, 1), jnp.float32),
        grid=(bs, n_outer, n_inner),
        in_specs=[x_spec3,
                  pl.BlockSpec((1, D, 1), lambda b, no, ni: (0, 0, 0))],
        out_specs=pl.BlockSpec((1, 1, 1), lambda b, no, ni: (b * n_outer + no, 0, 0)),
        compiler_params=reduce_params,
    )(x_dn, mean)

    var = jnp.sum(nsum_part) / jnp.float32(bs * n_valid)

    # packed constants for pass 3: [mean | trp_vec | beta | tp0_vec | scale | pad] -> (1, D, 8)
    origin = jnp.zeros((1, D, 1), jnp.float32).at[0, 0, 0].set(SQRT_K)
    beta_dn = beta.reshape(1, D, 1)
    trp = (mean + origin) / (SQRT_K + mean[:, 0:1, :])
    tp0 = (origin + beta_dn) / (K + SQRT_K * beta_dn[:, 0:1, :])
    scale = gamma.reshape(()) / (var + BN_EPS)
    scale_col = jnp.broadcast_to(scale, (1, D, 1)).astype(jnp.float32)
    consts = jnp.concatenate(
        [mean, trp, beta_dn, tp0, scale_col, jnp.zeros((1, D, 3), jnp.float32)], axis=-1)

    # ---- pass 3: fused normalize + expmap(beta) + per-group time -----------------------------
    y_dn, t_grp = pl.pallas_call(
        functools.partial(_normalize_kernel, g=g, cm1=cm1),
        out_shape=(jax.ShapeDtypeStruct((bs, D, n_pad), jnp.float32),
                   jax.ShapeDtypeStruct((bs, g, n_pad), jnp.float32)),
        grid=(bs, nt),
        in_specs=[pl.BlockSpec((1, D, tn), lambda b, n: (b, 0, n)),
                  pl.BlockSpec((1, D, 8), lambda b, n: (0, 0, 0))],
        out_specs=(pl.BlockSpec((1, D, tn), lambda b, n: (b, 0, n)),
                   pl.BlockSpec((1, g, tn), lambda b, n: (b, 0, n))),
        compiler_params=par_params,
    )(x_dn, consts)

    return y_dn, t_grp


# ---------------------------------------------------------------------------
# driver: single-pass resident path
# ---------------------------------------------------------------------------
def _lorentz_batchnorm_fused(x_dn, beta, gamma, g, n_valid):
    bs, D, n_pad = x_dn.shape
    cm1 = (D - 1) // g
    return pl.pallas_call(
        functools.partial(_fused_kernel, g=g, cm1=cm1, n_valid=n_valid),
        out_shape=(jax.ShapeDtypeStruct((bs, D, n_pad), jnp.float32),
                   jax.ShapeDtypeStruct((bs, g, n_pad), jnp.float32)),
        compiler_params=pltpu.CompilerParams(vmem_limit_bytes=40 * 1024 * 1024),
    )(x_dn, beta.reshape(1, D, 1), gamma.reshape(1, 1, 1))


# ---------------------------------------------------------------------------
# full module forward: flatten groups -> Lorentz BN -> split groups
# ---------------------------------------------------------------------------
@functools.partial(jax.jit, static_argnames=("force_multipass",))
def group_lorentz_batchnorm2d(x, beta, gamma, force_multipass=False):
    """x: (bs, g, H, W, C) channel-last Lorentz points (time first). Returns same shape."""
    bs, g, h, w, c = x.shape
    cm1 = c - 1
    N = h * w
    D = g * cm1 + 1
    tn, n_pad = _choose_tiling(N)

    # lorentz_flatten_group_dimension, emitted lane-dense as (bs, D, N); padded lanes are zero
    # vectors (sum-neutral; masked in the variance; sliced away from the outputs).
    space = jnp.transpose(x[..., 1:].reshape(bs, g, N, cm1), (0, 1, 3, 2)).reshape(bs, D - 1, N)
    time = jnp.sqrt(jnp.sum(space * space, axis=1, keepdims=True) + K)
    x_dn = jnp.concatenate([time, space], axis=1).astype(jnp.float32)
    if n_pad > N:
        x_dn = jnp.pad(x_dn, ((0, 0), (0, 0), (0, n_pad - N)))

    beta32 = beta.astype(jnp.float32)
    gamma32 = gamma.astype(jnp.float32)

    # conservative VMEM estimate for the resident path (sublane-padded, incl. temporaries)
    d_pad, g_pad = _round_up(D, 8), _round_up(g, 8)
    est_bytes = (5 * d_pad + g_pad) * bs * n_pad * 4
    use_fused = (not force_multipass) and est_bytes <= _FUSED_VMEM_BUDGET

    if use_fused:
        y_dn, t_grp = _lorentz_batchnorm_fused(x_dn, beta32, gamma32, g, N)
    else:
        y_dn, t_grp = _lorentz_batchnorm_multipass(x_dn, beta32, gamma32, g, N, tn)

    if n_pad > N:
        y_dn = y_dn[:, :, :N]
        t_grp = t_grp[:, :, :N]

    # lorentz_split_batch: regroup space components; per-group time already computed in-kernel
    y_space = jnp.transpose(y_dn[:, 1:, :].reshape(bs, g, cm1, N), (0, 1, 3, 2))
    y_space = y_space.reshape(bs, g, h, w, cm1)
    y_time = t_grp.reshape(bs, g, h, w, 1)
    return jnp.concatenate([y_time, y_space], axis=-1).astype(x.dtype)


# ---------------------------------------------------------------------------
# pure-JAX reference of the same forward (feature-last, mirrors the PyTorch module)
# ---------------------------------------------------------------------------
def _reference_forward(x, beta, gamma):
    bs, g, h, w, c = x.shape
    cm1 = c - 1
    N = h * w
    D = g * cm1 + 1

    space = jnp.transpose(x[..., 1:].reshape(bs, g, N, cm1), (0, 1, 3, 2)).reshape(bs, D - 1, N)
    time = jnp.sqrt(jnp.sum(space * space, axis=1, keepdims=True) + K)
    xg = jnp.transpose(jnp.concatenate([time, space], axis=1), (0, 2, 1))   # (bs, N, D)

    def inner(u, v):
        return jnp.sum(u * v, axis=-1, keepdims=True) - 2.0 * u[..., 0:1] * v[..., 0:1]

    def centroid(pts, axis):
        ave = jnp.mean(pts, axis=axis)
        return SQRT_K * ave / jnp.sqrt(jnp.maximum(jnp.abs(inner(ave, ave)), CENTROID_EPS))

    mean = centroid(centroid(xg, axis=1), axis=0).reshape(1, 1, D)

    ixy = inner(mean, xg)
    d = jnp.maximum(-ixy / K, 1.0)
    dist = SQRT_K * jnp.log(d + jnp.sqrt(jnp.maximum(d * d - 1.0, ACOSH_EPS)))
    nomin = xg + (ixy / K) * mean
    x_T = dist * nomin / jnp.sqrt(jnp.maximum(inner(nomin, nomin), NORM_EPS))   # logmap
    origin = jnp.zeros((D,), jnp.float32).at[0].set(SQRT_K)
    x_T = x_T - x_T[..., 0:1] * ((mean + origin) / (SQRT_K + mean[..., 0:1]))   # transp0back
    var = jnp.mean(jnp.linalg.norm(x_T, axis=-1))
    x_T = x_T * (gamma.reshape(()) / (var + BN_EPS))
    beta_b = beta.reshape(1, 1, D)
    x_T = x_T + inner(beta_b, x_T) * ((origin + beta_b) / (K + SQRT_K * beta_b[..., 0:1]))
    un = jnp.sqrt(jnp.maximum(inner(x_T, x_T), NORM_EPS))
    y = jnp.cosh(un / SQRT_K) * beta_b + SQRT_K * jnp.sinh(un / SQRT_K) * x_T / un

    y = jnp.transpose(y, (0, 2, 1))                                             # (bs, D, N)
    y_space = jnp.transpose(y[:, 1:, :].reshape(bs, g, cm1, N), (0, 1, 3, 2))
    y_space = y_space.reshape(bs, g, h, w, cm1)
    y_time = jnp.sqrt(jnp.sum(y_space * y_space, axis=-1, keepdims=True) + K)
    return jnp.concatenate([y_time, y_space], axis=-1)


if __name__ == "__main__":
    key = jax.random.PRNGKey(0)
    # small shape: D = g*(c-1)+1 = 17, N = 288 -> exercises lane padding (288 -> 384) and tiling
    bs, g, h, w, c = 2, 4, 16, 18, 5
    D = g * (c - 1) + 1

    # deterministic parameters per the module's __init__: beta = manifold.origin(D), gamma = 1
    beta = jnp.zeros((D,), dtype=jnp.float32).at[0].set(jnp.sqrt(jnp.float32(K)))
    gamma = jnp.ones((1,), dtype=jnp.float32)

    # deterministic on-manifold input: random space components + recomputed per-group time
    space = 0.5 * jax.random.normal(key, (bs, g, h, w, c - 1), dtype=jnp.float32)
    time = jnp.sqrt(jnp.sum(space * space, axis=-1, keepdims=True) + K)
    x = jnp.concatenate([time, space], axis=-1)          # (bs, g, h, w, c)

    out_fused = jax.block_until_ready(group_lorentz_batchnorm2d(x, beta, gamma))
    out_tiled = jax.block_until_ready(
        group_lorentz_batchnorm2d(x, beta, gamma, force_multipass=True))
    ref = jax.block_until_ready(_reference_forward(x, beta, gamma))

    assert out_fused.shape == x.shape and out_tiled.shape == x.shape
    assert bool(jnp.all(jnp.isfinite(out_fused))) and bool(jnp.all(jnp.isfinite(out_tiled)))
    assert bool(jnp.allclose(out_fused, out_tiled, rtol=1e-3, atol=1e-3))
    assert bool(jnp.allclose(out_fused, ref, rtol=1e-3, atol=1e-3))
    assert bool(jnp.allclose(out_tiled, ref, rtol=1e-3, atol=1e-3))
    print("KERNEL_OK")
</pallas_src>

<mosaic_0001>
module attributes {stable_mosaic.version = 11 : i64} {
  func.func @_fused_kernel(%arg0: memref<2x17x384xf32, #tpu.memory_space<vmem>>, %arg1: memref<1x17x1xf32, #tpu.memory_space<vmem>>, %arg2: memref<1x1x1xf32, #tpu.memory_space<vmem>>, %arg3: memref<2x17x384xf32, #tpu.memory_space<vmem>>, %arg4: memref<2x4x384xf32, #tpu.memory_space<vmem>>) attributes {dimension_semantics = [], scalar_prefetch = 0 : i64, scratch_operands = 0 : i64, tpu.core_type = #tpu.core_type<tc>} {
    %c0 = arith.constant 0 : index
    %c0_0 = arith.constant 0 : index
    %c0_1 = arith.constant 0 : index
    %0 = vector.load %arg0[%c0, %c0_0, %c0_1] : memref<2x17x384xf32, #tpu.memory_space<vmem>>, vector<2x17x384xf32>
    %cst = arith.constant dense<0.000000e+00> : vector<2x17xf32>
    %1 = vector.multi_reduction <add>, %0, %cst [2] : vector<2x17x384xf32> to vector<2x17xf32>
    %2 = vector.shape_cast %1 : vector<2x17xf32> to vector<2x17x1xf32>
    %cst_2 = arith.constant 2.880000e+02 : f32
    %3 = vector.broadcast %cst_2 : f32 to vector<2x17x1xf32>
    %4 = arith.divf %2, %3 : vector<2x17x1xf32>
    %5 = arith.mulf %4, %4 : vector<2x17x1xf32>
    %cst_3 = arith.constant dense<0.000000e+00> : vector<2x1xf32>
    %6 = vector.multi_reduction <add>, %5, %cst_3 [1] : vector<2x17x1xf32> to vector<2x1xf32>
    %7 = vector.shape_cast %6 : vector<2x1xf32> to vector<2x1x1xf32>
    %8 = vector.extract_strided_slice %4 {offsets = [0, 0, 0], sizes = [2, 1, 1], strides = [1, 1, 1]} : vector<2x17x1xf32> to vector<2x1x1xf32>
    %9 = arith.mulf %8, %8 : vector<2x1x1xf32>
    %cst_4 = arith.constant 2.000000e+00 : f32
    %10 = vector.broadcast %cst_4 : f32 to vector<2x1x1xf32>
    %11 = arith.mulf %10, %9 : vector<2x1x1xf32>
    %12 = arith.subf %7, %11 : vector<2x1x1xf32>
    %cst_5 = arith.constant 1.000000e+00 : f32
    %13 = vector.broadcast %cst_5 : f32 to vector<2x17x1xf32>
    %14 = arith.mulf %13, %4 : vector<2x17x1xf32>
    %15 = math.absf %12 : vector<2x1x1xf32>
    %cst_6 = arith.constant 9.99999993E-9 : f32
    %16 = vector.broadcast %cst_6 : f32 to vector<2x1x1xf32>
    %17 = arith.maximumf %15, %16 : vector<2x1x1xf32>
    %18 = math.sqrt %17 : vector<2x1x1xf32>
    %19 = vector.broadcast %18 : vector<2x1x1xf32> to vector<2x17x1xf32>
    %20 = arith.divf %14, %19 : vector<2x17x1xf32>
    %cst_7 = arith.constant dense<0.000000e+00> : vector<17x1xf32>
    %21 = vector.multi_reduction <add>, %20, %cst_7 [0] : vector<2x17x1xf32> to vector<17x1xf32>
    %22 = vector.shape_cast %21 : vector<17x1xf32> to vector<1x17x1xf32>
    %cst_8 = arith.constant 2.000000e+00 : f32
    %23 = vector.broadcast %cst_8 : f32 to vector<1x17x1xf32>
    %24 = arith.divf %22, %23 : vector<1x17x1xf32>
    %25 = arith.mulf %24, %24 : vector<1x17x1xf32>
    %cst_9 = arith.constant dense<0.000000e+00> : vector<1x1xf32>
    %26 = vector.multi_reduction <add>, %25, %cst_9 [1] : vector<1x17x1xf32> to vector<1x1xf32>
    %27 = vector.shape_cast %26 : vector<1x1xf32> to vector<1x1x1xf32>
    %28 = vector.extract_strided_slice %24 {offsets = [0, 0, 0], sizes = [1, 1, 1], strides = [1, 1, 1]} : vector<1x17x1xf32> to vector<1x1x1xf32>
    %29 = arith.mulf %28, %28 : vector<1x1x1xf32>
    %cst_10 = arith.constant 2.000000e+00 : f32
    %30 = vector.broadcast %cst_10 : f32 to vector<1x1x1xf32>
    %31 = arith.mulf %30, %29 : vector<1x1x1xf32>
    %32 = arith.subf %27, %31 : vector<1x1x1xf32>
    %cst_11 = arith.constant 1.000000e+00 : f32
    %33 = vector.broadcast %cst_11 : f32 to vector<1x17x1xf32>
    %34 = arith.mulf %33, %24 : vector<1x17x1xf32>
    %35 = math.absf %32 : vector<1x1x1xf32>
    %cst_12 = arith.constant 9.99999993E-9 : f32
    %36 = vector.broadcast %cst_12 : f32 to vector<1x1x1xf32>
    %37 = arith.maximumf %35, %36 : vector<1x1x1xf32>
    %38 = math.sqrt %37 : vector<1x1x1xf32>
    %39 = vector.broadcast %38 : vector<1x1x1xf32> to vector<1x17x1xf32>
    %40 = arith.divf %34, %39 : vector<1x17x1xf32>
    %41 = vector.broadcast %40 : vector<1x17x1xf32> to vector<2x17x384xf32>
    %42 = arith.mulf %41, %0 : vector<2x17x384xf32>
    %cst_13 = arith.constant dense<0.000000e+00> : vector<2x384xf32>
    %43 = vector.multi_reduction <add>, %42, %cst_13 [1] : vector<2x17x384xf32> to vector<2x384xf32>
    %44 = vector.shape_cast %43 : vector<2x384xf32> to vector<2x1x384xf32>
    %45 = vector.extract_strided_slice %40 {offsets = [0, 0, 0], sizes = [1, 1, 1], strides = [1, 1, 1]} : vector<1x17x1xf32> to vector<1x1x1xf32>
    %cst_14 = arith.constant 2.000000e+00 : f32
    %46 = vector.broadcast %cst_14 : f32 to vector<1x1x1xf32>
    %47 = arith.mulf %46, %45 : vector<1x1x1xf32>
    %48 = vector.extract_strided_slice %0 {offsets = [0, 0, 0], sizes = [2, 1, 384], strides = [1, 1, 1]} : vector<2x17x384xf32> to vector<2x1x384xf32>
    %49 = vector.broadcast %47 : vector<1x1x1xf32> to vector<2x1x384xf32>
    %50 = arith.mulf %49, %48 : vector<2x1x384xf32>
    %51 = arith.subf %44, %50 : vector<2x1x384xf32>
    %cst_15 = arith.constant 0.000000e+00 : f32
    %52 = vector.broadcast %cst_15 : f32 to vector<2x1x384xf32>
    %53 = arith.subf %52, %51 : vector<2x1x384xf32>
    %cst_16 = arith.constant 1.000000e+00 : f32
    %54 = vector.broadcast %cst_16 : f32 to vector<2x1x384xf32>
    %55 = arith.divf %53, %54 : vector<2x1x384xf32>
    %cst_17 = arith.constant 1.000000e+00 : f32
    %56 = vector.broadcast %cst_17 : f32 to vector<2x1x384xf32>
    %57 = arith.maximumf %55, %56 : vector<2x1x384xf32>
    %58 = arith.mulf %57, %57 : vector<2x1x384xf32>
    %cst_18 = arith.constant 1.000000e+00 : f32
    %59 = vector.broadcast %cst_18 : f32 to vector<2x1x384xf32>
    %60 = arith.subf %58, %59 : vector<2x1x384xf32>
    %cst_19 = arith.constant 1.000000e-15 : f32
    %61 = vector.broadcast %cst_19 : f32 to vector<2x1x384xf32>
    %62 = arith.maximumf %60, %61 : vector<2x1x384xf32>
    %63 = math.sqrt %62 : vector<2x1x384xf32>
    %64 = arith.addf %57, %63 : vector<2x1x384xf32>
    %65 = math.log %64 : vector<2x1x384xf32>
    %cst_20 = arith.constant 1.000000e+00 : f32
    %66 = vector.broadcast %cst_20 : f32 to vector<2x1x384xf32>
    %67 = arith.mulf %66, %65 : vector<2x1x384xf32>
    %68 = tpu.iota {dimensions = array<i32: 2>} : vector<2x1x384xi32>
    %c288_i32 = arith.constant 288 : i32
    %69 = vector.broadcast %c288_i32 : i32 to vector<2x1x384xi32>
    %70 = arith.cmpi slt, %68, %69 : vector<2x1x384xi32>
    %cst_21 = arith.constant 0.000000e+00 : f32
    %71 = vector.broadcast %cst_21 : f32 to vector<2x1x384xf32>
    %72 = arith.select %70, %67, %71 : vector<2x1x384xi1>, vector<2x1x384xf32>
    %cst_22 = arith.constant dense<0.000000e+00> : vector<2x1xf32>
    %73 = vector.multi_reduction <add>, %72, %cst_22 [2] : vector<2x1x384xf32> to vector<2x1xf32>
    %74 = vector.shape_cast %73 : vector<2x1xf32> to vector<2x1x1xf32>
    %cst_23 = arith.constant dense<0.000000e+00> : vector<1x1xf32>
    %75 = vector.multi_reduction <add>, %74, %cst_23 [0] : vector<2x1x1xf32> to vector<1x1xf32>
    %76 = vector.shape_cast %75 : vector<1x1xf32> to vector<1x1x1xf32>
    %77 = vector.shape_cast %76 : vector<1x1x1xf32> to vector<1x1xf32>
    %cst_24 = arith.constant 5.760000e+02 : f32
    %78 = vector.broadcast %cst_24 : f32 to vector<1x1xf32>
    %79 = arith.divf %77, %78 : vector<1x1xf32>
    %c0_25 = arith.constant 0 : index
    %c0_26 = arith.constant 0 : index
    %c0_27 = arith.constant 0 : index
    %80 = vector.load %arg2[%c0_25, %c0_26, %c0_27] : memref<1x1x1xf32, #tpu.memory_space<vmem>>, vector<1x1x1xf32>
    %81 = vector.shape_cast %80 : vector<1x1x1xf32> to vector<1x1xf32>
    %cst_28 = arith.constant 9.99999974E-6 : f32
    %82 = vector.broadcast %cst_28 : f32 to vector<1x1xf32>
    %83 = arith.addf %79, %82 : vector<1x1xf32>
    %84 = arith.divf %81, %83 : vector<1x1xf32>
    %c0_29 = arith.constant 0 : index
    %c0_30 = arith.constant 0 : index
    %c0_31 = arith.constant 0 : index
    %85 = vector.load %arg1[%c0_29, %c0_30, %c0_31] : memref<1x17x1xf32, #tpu.memory_space<vmem>>, vector<1x17x1xf32>
    %86 = tpu.iota {dimensions = array<i32: 1>} : vector<1x17x1xi32>
    %c0_i32 = arith.constant 0 : i32
    %87 = vector.broadcast %c0_i32 : i32 to vector<1x17x1xi32>
    %88 = arith.cmpi eq, %86, %87 : vector<1x17x1xi32>
    %cst_32 = arith.constant 1.000000e+00 : f32
    %cst_33 = arith.constant 0.000000e+00 : f32
    %89 = vector.broadcast %cst_32 : f32 to vector<1x17x1xf32>
    %90 = vector.broadcast %cst_33 : f32 to vector<1x17x1xf32>
    %91 = arith.select %88, %89, %90 : vector<1x17x1xi1>, vector<1x17x1xf32>
    %92 = arith.addf %40, %91 : vector<1x17x1xf32>
    %93 = vector.extract_strided_slice %40 {offsets = [0, 0, 0], sizes = [1, 1, 1], strides = [1, 1, 1]} : vector<1x17x1xf32> to vector<1x1x1xf32>
    %cst_34 = arith.constant 1.000000e+00 : f32
    %94 = vector.broadcast %cst_34 : f32 to vector<1x1x1xf32>
    %95 = arith.addf %94, %93 : vector<1x1x1xf32>
    %96 = vector.broadcast %95 : vector<1x1x1xf32> to vector<1x17x1xf32>
    %97 = arith.divf %92, %96 : vector<1x17x1xf32>
    %98 = arith.addf %91, %85 : vector<1x17x1xf32>
    %99 = vector.extract_strided_slice %85 {offsets = [0, 0, 0], sizes = [1, 1, 1], strides = [1, 1, 1]} : vector<1x17x1xf32> to vector<1x1x1xf32>
    %cst_35 = arith.constant 1.000000e+00 : f32
    %100 = vector.broadcast %cst_35 : f32 to vector<1x1x1xf32>
    %101 = arith.mulf %100, %99 : vector<1x1x1xf32>
    %cst_36 = arith.constant 1.000000e+00 : f32
    %102 = vector.broadcast %cst_36 : f32 to vector<1x1x1xf32>
    %103 = arith.addf %102, %101 : vector<1x1x1xf32>
    %104 = vector.broadcast %103 : vector<1x1x1xf32> to vector<1x17x1xf32>
    %105 = arith.divf %98, %104 : vector<1x17x1xf32>
    %106 = vector.shape_cast %40 : vector<1x17x1xf32> to vector<17x1xf32>
    %107 = vector.shape_cast %97 : vector<1x17x1xf32> to vector<17x1xf32>
    %108 = vector.shape_cast %85 : vector<1x17x1xf32> to vector<17x1xf32>
    %109 = vector.shape_cast %105 : vector<1x17x1xf32> to vector<17x1xf32>
    %c0_i32_37 = arith.constant 0 : i32
    %c2_i32 = arith.constant 2 : i32
    %110 = arith.addi %c0_i32_37, %c2_i32 : i32
    %c1_i32 = arith.constant 1 : i32
    scf.for %arg5 = %c0_i32_37 to %110 step %c1_i32  : i32 {
      %c1_i32_39 = arith.constant 1 : i32
      %111 = arith.muli %arg5, %c1_i32_39 : i32
      %c0_i32_40 = arith.constant 0 : i32
      %112 = arith.addi %c0_i32_40, %111 : i32
      %113 = arith.index_cast %112 : i32 to index
      %c0_41 = arith.constant 0 : index
      %c0_42 = arith.constant 0 : index
      %114 = vector.load %arg0[%113, %c0_41, %c0_42] : memref<2x17x384xf32, #tpu.memory_space<vmem>>, vector<1x17x384xf32>
      %115 = vector.shape_cast %114 : vector<1x17x384xf32> to vector<17x384xf32>
      %116 = vector.broadcast %106 : vector<17x1xf32> to vector<17x384xf32>
      %117 = arith.mulf %116, %115 : vector<17x384xf32>
      %cst_43 = arith.constant dense<0.000000e+00> : vector<384xf32>
      %118 = vector.multi_reduction <add>, %117, %cst_43 [0] : vector<17x384xf32> to vector<384xf32>
      %119 = vector.shape_cast %118 : vector<384xf32> to vector<1x384xf32>
      %120 = vector.extract_strided_slice %106 {offsets = [0, 0], sizes = [1, 1], strides = [1, 1]} : vector<17x1xf32> to vector<1x1xf32>
      %cst_44 = arith.constant 2.000000e+00 : f32
      %121 = vector.broadcast %cst_44 : f32 to vector<1x1xf32>
      %122 = arith.mulf %121, %120 : vector<1x1xf32>
      %123 = vector.extract_strided_slice %115 {offsets = [0, 0], sizes = [1, 384], strides = [1, 1]} : vector<17x384xf32> to vector<1x384xf32>
      %124 = vector.broadcast %122 : vector<1x1xf32> to vector<1x384xf32>
      %125 = arith.mulf %124, %123 : vector<1x384xf32>
      %126 = arith.subf %119, %125 : vector<1x384xf32>
      %cst_45 = arith.constant 0.000000e+00 : f32
      %127 = vector.broadcast %cst_45 : f32 to vector<1x384xf32>
      %128 = arith.subf %127, %126 : vector<1x384xf32>
      %cst_46 = arith.constant 1.000000e+00 : f32
      %129 = vector.broadcast %cst_46 : f32 to vector<1x384xf32>
      %130 = arith.divf %128, %129 : vector<1x384xf32>
      %cst_47 = arith.constant 1.000000e+00 : f32
      %131 = vector.broadcast %cst_47 : f32 to vector<1x384xf32>
      %132 = arith.maximumf %130, %131 : vector<1x384xf32>
      %133 = arith.mulf %132, %132 : vector<1x384xf32>
      %cst_48 = arith.constant 1.000000e+00 : f32
      %134 = vector.broadcast %cst_48 : f32 to vector<1x384xf32>
      %135 = arith.subf %133, %134 : vector<1x384xf32>
      %cst_49 = arith.constant 1.000000e-15 : f32
      %136 = vector.broadcast %cst_49 : f32 to vector<1x384xf32>
      %137 = arith.maximumf %135, %136 : vector<1x384xf32>
      %138 = math.sqrt %137 : vector<1x384xf32>
      %139 = arith.addf %132, %138 : vector<1x384xf32>
      %140 = math.log %139 : vector<1x384xf32>
      %cst_50 = arith.constant 1.000000e+00 : f32
      %141 = vector.broadcast %cst_50 : f32 to vector<1x384xf32>
      %142 = arith.mulf %141, %140 : vector<1x384xf32>
      %cst_51 = arith.constant 1.000000e+00 : f32
      %143 = vector.broadcast %cst_51 : f32 to vector<1x384xf32>
      %144 = arith.divf %126, %143 : vector<1x384xf32>
      %145 = vector.broadcast %144 : vector<1x384xf32> to vector<17x384xf32>
      %146 = vector.broadcast %106 : vector<17x1xf32> to vector<17x384xf32>
      %147 = arith.mulf %145, %146 : vector<17x384xf32>
      %148 = arith.addf %115, %147 : vector<17x384xf32>
      %149 = arith.mulf %148, %148 : vector<17x384xf32>
      %cst_52 = arith.constant dense<0.000000e+00> : vector<384xf32>
      %150 = vector.multi_reduction <add>, %149, %cst_52 [0] : vector<17x384xf32> to vector<384xf32>
      %151 = vector.shape_cast %150 : vector<384xf32> to vector<1x384xf32>
      %152 = vector.extract_strided_slice %148 {offsets = [0, 0], sizes = [1, 384], strides = [1, 1]} : vector<17x384xf32> to vector<1x384xf32>
      %cst_53 = arith.constant 2.000000e+00 : f32
      %153 = vector.broadcast %cst_53 : f32 to vector<1x384xf32>
      %154 = arith.mulf %153, %152 : vector<1x384xf32>
      %155 = vector.extract_strided_slice %148 {offsets = [0, 0], sizes = [1, 384], strides = [1, 1]} : vector<17x384xf32> to vector<1x384xf32>
      %156 = arith.mulf %154, %155 : vector<1x384xf32>
      %157 = arith.subf %151, %156 : vector<1x384xf32>
      %cst_54 = arith.constant 9.99999993E-9 : f32
      %158 = vector.broadcast %cst_54 : f32 to vector<1x384xf32>
      %159 = arith.maximumf %157, %158 : vector<1x384xf32>
      %160 = vector.broadcast %84 : vector<1x1xf32> to vector<1x384xf32>
      %161 = arith.mulf %142, %160 : vector<1x384xf32>
      %162 = math.rsqrt %159 : vector<1x384xf32>
      %163 = arith.mulf %161, %162 : vector<1x384xf32>
      %164 = vector.broadcast %163 : vector<1x384xf32> to vector<17x384xf32>
      %165 = arith.mulf %164, %148 : vector<17x384xf32>
      %166 = vector.extract_strided_slice %165 {offsets = [0, 0], sizes = [1, 384], strides = [1, 1]} : vector<17x384xf32> to vector<1x384xf32>
      %167 = vector.broadcast %166 : vector<1x384xf32> to vector<17x384xf32>
      %168 = vector.broadcast %107 : vector<17x1xf32> to vector<17x384xf32>
      %169 = arith.mulf %167, %168 : vector<17x384xf32>
      %170 = arith.subf %165, %169 : vector<17x384xf32>
      %171 = vector.broadcast %108 : vector<17x1xf32> to vector<17x384xf32>
      %172 = arith.mulf %171, %170 : vector<17x384xf32>
      %cst_55 = arith.constant dense<0.000000e+00> : vector<384xf32>
      %173 = vector.multi_reduction <add>, %172, %cst_55 [0] : vector<17x384xf32> to vector<384xf32>
      %174 = vector.shape_cast %173 : vector<384xf32> to vector<1x384xf32>
      %175 = vector.extract_strided_slice %108 {offsets = [0, 0], sizes = [1, 1], strides = [1, 1]} : vector<17x1xf32> to vector<1x1xf32>
      %cst_56 = arith.constant 2.000000e+00 : f32
      %176 = vector.broadcast %cst_56 : f32 to vector<1x1xf32>
      %177 = arith.mulf %176, %175 : vector<1x1xf32>
      %178 = vector.extract_strided_slice %170 {offsets = [0, 0], sizes = [1, 384], strides = [1, 1]} : vector<17x384xf32> to vector<1x384xf32>
      %179 = vector.broadcast %177 : vector<1x1xf32> to vector<1x384xf32>
      %180 = arith.mulf %179, %178 : vector<1x384xf32>
      %181 = arith.subf %174, %180 : vector<1x384xf32>
      %182 = vector.broadcast %181 : vector<1x384xf32> to vector<17x384xf32>
      %183 = vector.broadcast %109 : vector<17x1xf32> to vector<17x384xf32>
      %184 = arith.mulf %182, %183 : vector<17x384xf32>
      %185 = arith.addf %170, %184 : vector<17x384xf32>
      %186 = arith.mulf %185, %185 : vector<17x384xf32>
      %cst_57 = arith.constant dense<0.000000e+00> : vector<384xf32>
      %187 = vector.multi_reduction <add>, %186, %cst_57 [0] : vector<17x384xf32> to vector<384xf32>
      %188 = vector.shape_cast %187 : vector<384xf32> to vector<1x384xf32>
      %189 = vector.extract_strided_slice %185 {offsets = [0, 0], sizes = [1, 384], strides = [1, 1]} : vector<17x384xf32> to vector<1x384xf32>
      %cst_58 = arith.constant 2.000000e+00 : f32
      %190 = vector.broadcast %cst_58 : f32 to vector<1x384xf32>
      %191 = arith.mulf %190, %189 : vector<1x384xf32>
      %192 = vector.extract_strided_slice %185 {offsets = [0, 0], sizes = [1, 384], strides = [1, 1]} : vector<17x384xf32> to vector<1x384xf32>
      %193 = arith.mulf %191, %192 : vector<1x384xf32>
      %194 = arith.subf %188, %193 : vector<1x384xf32>
      %cst_59 = arith.constant 9.99999993E-9 : f32
      %195 = vector.broadcast %cst_59 : f32 to vector<1x384xf32>
      %196 = arith.maximumf %194, %195 : vector<1x384xf32>
      %197 = math.sqrt %196 : vector<1x384xf32>
      %cst_60 = arith.constant 1.000000e+00 : f32
      %198 = vector.broadcast %cst_60 : f32 to vector<1x384xf32>
      %199 = arith.divf %197, %198 : vector<1x384xf32>
      %200 = math.exp %199 : vector<1x384xf32>
      %cst_61 = arith.constant 0.000000e+00 : f32
      %201 = vector.broadcast %cst_61 : f32 to vector<1x384xf32>
      %202 = arith.subf %201, %197 : vector<1x384xf32>
      %cst_62 = arith.constant 1.000000e+00 : f32
      %203 = vector.broadcast %cst_62 : f32 to vector<1x384xf32>
      %204 = arith.divf %202, %203 : vector<1x384xf32>
      %205 = math.exp %204 : vector<1x384xf32>
      %206 = arith.addf %200, %205 : vector<1x384xf32>
      %cst_63 = arith.constant 5.000000e-01 : f32
      %207 = vector.broadcast %cst_63 : f32 to vector<1x384xf32>
      %208 = arith.mulf %207, %206 : vector<1x384xf32>
      %209 = arith.subf %200, %205 : vector<1x384xf32>
      %cst_64 = arith.constant 5.000000e-01 : f32
      %210 = vector.broadcast %cst_64 : f32 to vector<1x384xf32>
      %211 = arith.mulf %210, %209 : vector<1x384xf32>
      %212 = vector.broadcast %208 : vector<1x384xf32> to vector<17x384xf32>
      %213 = vector.broadcast %108 : vector<17x1xf32> to vector<17x384xf32>
      %214 = arith.mulf %212, %213 : vector<17x384xf32>
      %cst_65 = arith.constant 1.000000e+00 : f32
      %215 = vector.broadcast %cst_65 : f32 to vector<1x384xf32>
      %216 = arith.mulf %215, %211 : vector<1x384xf32>
      %217 = math.rsqrt %196 : vector<1x384xf32>
      %218 = arith.mulf %216, %217 : vector<1x384xf32>
      %219 = vector.broadcast %218 : vector<1x384xf32> to vector<17x384xf32>
      %220 = arith.mulf %219, %185 : vector<17x384xf32>
      %221 = arith.addf %214, %220 : vector<17x384xf32>
      %222 = arith.index_cast %112 : i32 to index
      %c0_66 = arith.constant 0 : index
      %c0_67 = arith.constant 0 : index
      %223 = vector.load %arg3[%222, %c0_66, %c0_67] : memref<2x17x384xf32, #tpu.memory_space<vmem>>, vector<1x17x384xf32>
      %224 = vector.shape_cast %223 : vector<1x17x384xf32> to vector<17x384xf32>
      %225 = vector.shape_cast %221 : vector<17x384xf32> to vector<1x17x384xf32>
      tpu.vector_store %arg3[%222, %c0_66, %c0_67], %225 {strides = array<i32>} : memref<2x17x384xf32, #tpu.memory_space<vmem>>, vector<1x17x384xf32>,
      %226 = arith.mulf %221, %221 : vector<17x384xf32>
      %227 = vector.extract_strided_slice %226 {offsets = [1, 0], sizes = [4, 384], strides = [1, 1]} : vector<17x384xf32> to vector<4x384xf32>
      %cst_68 = arith.constant dense<0.000000e+00> : vector<384xf32>
      %228 = vector.multi_reduction <add>, %227, %cst_68 [0] : vector<4x384xf32> to vector<384xf32>
      %229 = vector.shape_cast %228 : vector<384xf32> to vector<1x384xf32>
      %230 = vector.extract_strided_slice %226 {offsets = [5, 0], sizes = [4, 384], strides = [1, 1]} : vector<17x384xf32> to vector<4x384xf32>
      %cst_69 = arith.constant dense<0.000000e+00> : vector<384xf32>
      %231 = vector.multi_reduction <add>, %230, %cst_69 [0] : vector<4x384xf32> to vector<384xf32>
      %232 = vector.shape_cast %231 : vector<384xf32> to vector<1x384xf32>
      %233 = vector.extract_strided_slice %226 {offsets = [9, 0], sizes = [4, 384], strides = [1, 1]} : vector<17x384xf32> to vector<4x384xf32>
      %cst_70 = arith.constant dense<0.000000e+00> : vector<384xf32>
      %234 = vector.multi_reduction <add>, %233, %cst_70 [0] : vector<4x384xf32> to vector<384xf32>
      %235 = vector.shape_cast %234 : vector<384xf32> to vector<1x384xf32>
      %236 = vector.extract_strided_slice %226 {offsets = [13, 0], sizes = [4, 384], strides = [1, 1]} : vector<17x384xf32> to vector<4x384xf32>
      %cst_71 = arith.constant dense<0.000000e+00> : vector<384xf32>
      %237 = vector.multi_reduction <add>, %236, %cst_71 [0] : vector<4x384xf32> to vector<384xf32>
      %238 = vector.shape_cast %237 : vector<384xf32> to vector<1x384xf32>
      %239 = tpu.concatenate %229, %232, %235, %238 in 0 : vector<1x384xf32>, vector<1x384xf32>, vector<1x384xf32>, vector<1x384xf32> -> vector<4x384xf32>
      %cst_72 = arith.constant 1.000000e+00 : f32
      %240 = vector.broadcast %cst_72 : f32 to vector<4x384xf32>
      %241 = arith.addf %239, %240 : vector<4x384xf32>
      %242 = math.sqrt %241 : vector<4x384xf32>
      %243 = arith.index_cast %112 : i32 to index
      %c0_73 = arith.constant 0 : index
      %c0_74 = arith.constant 0 : index
      %244 = vector.load %arg4[%243, %c0_73, %c0_74] : memref<2x4x384xf32, #tpu.memory_space<vmem>>, vector<1x4x384xf32>
      %245 = vector.shape_cast %244 : vector<1x4x384xf32> to vector<4x384xf32>
      %246 = vector.shape_cast %242 : vector<4x384xf32> to vector<1x4x384xf32>
      tpu.vector_store %arg4[%243, %c0_73, %c0_74], %246 {strides = array<i32>} : memref<2x4x384xf32, #tpu.memory_space<vmem>>, vector<1x4x384xf32>,
    }
    %c2_i32_38 = arith.constant 2 : i32
    return
  }
}

</mosaic_0001>

<bundles_post_ra>
// kernel: group_lorentz_batchnorm2d.1
= control target key start
LH: loop header
LB: loop body
LE: loop exit
PB: predicated region body
PF: predicated region fallthrough
CT: control target
= control target key end

     0   :  { %vm44_vm0 = vcmask 1040384   ;;  %v120_v36 = vlaneseq  ;;  %v1266_v42 = vmov 0.0   ;;  %s1573_s6 = smov 0   ;;  %s1929_s0 = inlined_call_operand.vmem [shape: f32[2,17,384], index: 0, kind: input, shape index: {}]   ;;  %s1930_s1 = inlined_call_operand.vmem [shape: f32[1,17,1], index: 1, kind: input, shape index: {}]   ;;  %s1931_s2 = inlined_call_operand.<no memory space> [shape: f32[1,1,1], index: 2, kind: input, shape index: {}]   ;;  %s1932_s3 = inlined_call_operand.vmem [shape: f32[2,17,384], index: 3, kind: output, shape index: {0}]   ;;  %s1933_s4 = inlined_call_operand.vmem [shape: f32[2,4,384], index: 4, kind: output, shape index: {1}]  }
   0x1   :  { %v1296_v0 = vld [vmem:[%s1929_s0 + $0x48] sm:$0xff]  ;;  %v1301_v1 = vld [vmem:[%s1929_s0 + $0x50] sm:$0xff]  ;;  %v1306_v2 = vld [vmem:[%s1929_s0 + $0x58] sm:$0xff] }
   0x2   :  { %v52_v3 = vadd.f32 %v1301_v1, %v1296_v0  ;;  %v1313_v4 = vld [vmem:[%s1929_s0] sm:$0xff]  ;;  %v1318_v5 = vld [vmem:[%s1929_s0 + $0x8] sm:$0xff]  ;;  %v1323_v6 = vld [vmem:[%s1929_s0 + $0x10] sm:$0xff]  ;;  %v121_v38 = vshrl.u32 %v120_v36, 7 }
   0x3   :  { %v36_v7 = vadd.f32 %v1318_v5, %v1313_v4  ;;  %v1330_v8 = vld [vmem:[%s1929_s0 + $0x60] sm:$0xff]  ;;  %v1335_v9 = vld [vmem:[%s1929_s0 + $0x68] sm:$0xff]  ;;  %v1340_v10 = vld [vmem:[%s1929_s0 + $0x70] sm:$0xff] }
   0x4   :  { %v53_v11 = vadd.f32 %v52_v3, %v1306_v2  ;;  %v56_v12 = vadd.f32 %v1335_v9, %v1330_v8  ;;  %v1348_v13 = vld [vmem:[%s1929_s0 + $0x18] sm:$0xff]  ;;  %v1353_v14 = vld [vmem:[%s1929_s0 + $0x20] sm:$0xff]  ;;  %v1358_v15 = vld [vmem:[%s1929_s0 + $0x28] sm:$0xff]  ;;  %v1414_v40 = vsub.s32 0, %v121_v38  ;;  %vm394_vm1 = vcmp.eq.s32.totalorder %v121_v38, 0 }
   0x5   :  { %v37_v16 = vadd.f32 %v36_v7, %v1323_v6  ;;  %v40_v17 = vadd.f32 %v1353_v14, %v1348_v13  ;;  %v1366_v18 = vld [vmem:[%s1929_s0 + $0x78] sm:$0x1]  ;;  %v1371_v19 = vld [vmem:[%s1929_s0 + $0x80] sm:$0x1]  ;;  %v1376_v20 = vld [vmem:[%s1929_s0 + $0x88] sm:$0x1] }
   0x6   :  { %54 = vadd.xlane.f32.xlu1 %v53_v11  ;;  %v57_v21 = vadd.f32 %v56_v12, %v1340_v10  ;;  %v60_v22 = vsel %vm44_vm0, %v1366_v18, 0.0  ;;  %v61_v23 = vsel %vm44_vm0, %v1371_v19, 0.0  ;;  %v1386_v24 = vld [vmem:[%s1929_s0 + $0x30] sm:$0x1]  ;;  %v63_v27 = vsel %vm44_vm0, %v1376_v20, 0.0  ;;  %v1410_v37 = vld [vmem:[%s1930_s1] sm:$0xff] }
   0x7   :  { %38 = vadd.xlane.f32.xlu0 %v37_v16  ;;  %v41_v25 = vadd.f32 %v40_v17, %v1358_v15  ;;  %v62_v26 = vadd.f32 %v61_v23, %v60_v22  ;;  %v1394_v28 = vld [vmem:[%s1929_s0 + $0x38] sm:$0x1]  ;;  %v1399_v29 = vld [vmem:[%s1929_s0 + $0x40] sm:$0x1]  ;;  %v45_v30 = vsel %vm44_vm0, %v1386_v24, 0.0  ;;  %v415_v39 = vadd.f32 1.0, %v1410_v37 }
   0x8   :  { %v46_v31 = vsel %vm44_vm0, %v1394_v28, 0.0  ;;  %v48_v32 = vsel %vm44_vm0, %v1399_v29, 0.0  ;;  %v1417_v43 = vsel %vm394_vm1, 1.0, %v1266_v42  ;;  %v1424_v45 = vld [vmem:[%s1930_s1 + $0x8] sm:$0xff]  ;;  %v1429_v46 = vld [vmem:[%s1930_s1 + $0x10] sm:$0x1] }
   0x9   :  { %v47_v33 = vadd.f32 %v46_v31, %v45_v30  ;;  %v64_v34 = vadd.f32 %v63_v27, %v62_v26  ;;  %v419_v41 = vrot.slane %v415_v39, %v1414_v40  ;;  %v412_v44 = vadd.f32 %v1417_v43, %v1410_v37 }
   0xa   :  { %58 = vadd.xlane.f32.xlu1 %v57_v21 }
   0xb   :  { %42 = vadd.xlane.f32.xlu0 %v41_v25  ;;  %v49_v35 = vadd.f32 %v48_v32, %v47_v33  ;;  %1172 = vrcp.f32 %v419_v41 }
   0xe   :  { %65 = vadd.xlane.f32.xlu1 %v64_v34 }
   0xf   :  { %50 = vadd.xlane.f32.xlu0 %v49_v35 }
  0x15   :  { %v1173_v47 = vpop.eup %1172 }
  0x16   :  { %v1431_v48 = vmul.f32 %v1173_v47, %v412_v44  ;;  %v1434_v49 = vmul.f32 %v1173_v47, %v1424_v45  ;;  %v1437_v50 = vmul.f32 %v1173_v47, %v1429_v46 }
  0x93   :  { %v55_v51 = vpop.xlane.xlu1 %54 }
  0x94   :  { %v39_v52 = vpop.xlane.xlu0 %38  ;;  %v71_v56 = vmul.f32 0.0034722222, %v55_v51 }
  0x95   :  { %v68_v58 = vmul.f32 0.0034722222, %v39_v52 }
  0x96   :  { %v77_v3 = vmul.f32 %v71_v56, %v71_v56 }
  0x97   :  { %v59_v53 = vpop.xlane.xlu1 %58  ;;  %v74_v11 = vmul.f32 %v68_v58, %v68_v58 }
  0x98   :  { %v1439_v54 = vmul.f32 0.0034722222, %v59_v53  ;;  %v43_v55 = vpop.xlane.xlu0 %42  ;;  %v99_v42 = vmul.f32 2.0, %v77_v3 }
  0x99   :  { %v1441_v57 = vmul.f32 0.0034722222, %v43_v55  ;;  %v98_v47 = vmul.f32 2.0, %v74_v11 }
  0x9a   :  { %v78_v59 = vmul.f32 %v1439_v54, %v1439_v54 }
  0x9b   :  { %v66_v60 = vpop.xlane.xlu1 %65  ;;  %v75_v61 = vmul.f32 %v1441_v57, %v1441_v57 }
  0x9c   :  { %v73_v62 = vmul.f32 0.0034722222, %v66_v60  ;;  %v51_v63 = vpop.xlane.xlu0 %50  ;;  %v89_v16 = vadd.f32 %v78_v59, %v77_v3 }
  0x9d   :  { %v70_v7 = vmul.f32 0.0034722222, %v51_v63  ;;  %v80_v21 = vadd.f32 %v75_v61, %v74_v11 }
  0x9e   :  { %v79_v12 = vmul.f32 %v73_v62, %v73_v62 }
  0x9f   :  { %v76_v17 = vmul.f32 %v70_v7, %v70_v7 }
  0xa0   :  { %v90_v22 = vsel %vm44_vm0, %v79_v12, 0.0 }
  0xa1   :  { %v91_v23 = vadd.f32 %v90_v22, %v89_v16  ;;  %v81_v25 = vsel %vm44_vm0, %v76_v17, 0.0 }
  0xa2   :  { %v82_v26 = vadd.f32 %v81_v25, %v80_v21 }
  0xa3   :  { %v92_v27 = vrot.slane %v91_v23, 4 }
  0xa4   :  { %v83_v30 = vrot.slane %v82_v26, 4 }
  0xa5   :  { %v93_v31 = vadd.f32 %v92_v27, %v91_v23 }
  0xa6   :  { %v84_v32 = vadd.f32 %v83_v30, %v82_v26 }
  0xa7   :  { %v94_v33 = vrot.slane %v93_v31, 2 }
  0xa8   :  { %v85_v34 = vrot.slane %v84_v32, 2 }
  0xa9   :  { %v95_v35 = vadd.f32 %v94_v33, %v93_v31 }
  0xaa   :  { %v86_v38 = vadd.f32 %v85_v34, %v84_v32 }
  0xab   :  { %v96_v39 = vrot.slane %v95_v35, 1 }
  0xac   :  { %v87_v41 = vrot.slane %v86_v38, 1 }
  0xad   :  { %v97_v44 = vadd.f32 %v96_v39, %v95_v35 }
  0xae   :  { %v88_v51 = vadd.f32 %v87_v41, %v86_v38 }
  0xaf   :  { %v101_v52 = vsub.f32 %v97_v44, %v99_v42 }
  0xb0   :  { %v100_v53 = vsub.f32 %v88_v51, %v98_v47 }
  0xb1   :  { %v103_v55 = vand.u32 2147483647, %v101_v52 }
  0xb2   :  { %v102_v59 = vand.u32 2147483647, %v100_v53 }
  0xb3   :  { %v105_v60 = vmax.f32 %v103_v55, 1e-08 }
  0xb4   :  { %v104_v61 = vmax.f32 %v102_v59, 1e-08 }
  0xb5   :  { %1174 = vrsqrt.f32 %v105_v60  ;;  %vm115_vm2 = vcmp.eq.f32.partialorder %v105_v60, inf  ;;  %v118_v17 = vand.u32 2147483648, %v105_v60  ;;  %vm117_vm3 = vcmp.eq.f32.partialorder %v105_v60, 0.0 }
  0xb6   :  { %1176 = vrsqrt.f32 %v104_v61  ;;  %vm108_vm4 = vcmp.eq.f32.partialorder %v104_v61, inf  ;;  %v111_v3 = vand.u32 2147483648, %v104_v61  ;;  %vm110_vm5 = vcmp.eq.f32.partialorder %v104_v61, 0.0 }
  0xbf   :  { %v1175_v63 = vpop.eup %1174 }
  0xc0   :  { %v1177_v12 = vpop.eup %1176  ;;  %v114_v16 = vmul.f32 %v1175_v63, %v105_v60 }
  0xc1   :  { %v107_v21 = vmul.f32 %v1177_v12, %v104_v61 }
  0xc2   :  { %v116_v22 = vsel %vm115_vm2, %v105_v60, %v114_v16 }
  0xc3   :  { %v119_v11 = vsel %vm117_vm3, %v118_v17, %v116_v22  ;;  %v109_v23 = vsel %vm108_vm4, %v104_v61, %v107_v21 }
  0xc4   :  { %v127_v25 = vrot.slane %v119_v11, %v1414_v40  ;;  %v112_v26 = vsel %vm110_vm5, %v111_v3, %v109_v23 }
  0xc5   :  { %v123_v27 = vrot.slane %v112_v26, %v1414_v40 }
  0xc6   :  { %1178 = vrcp.f32 %v127_v25 }
  0xc7   :  { %1180 = vrcp.f32 %v123_v27 }
  0xd0   :  { %v1179_v30 = vpop.eup %1178 }
  0xd1   :  { %v1181_v31 = vpop.eup %1180  ;;  %v135_v32 = vmul.f32 %v1179_v30, %v73_v62  ;;  %v133_v33 = vmul.f32 %v1179_v30, %v71_v56  ;;  %v134_v34 = vmul.f32 %v1179_v30, %v1439_v54 }
  0xd2   :  { %v129_v35 = vmul.f32 %v1181_v31, %v68_v58  ;;  %v130_v38 = vmul.f32 %v1181_v31, %v1441_v57  ;;  %v131_v39 = vmul.f32 %v1181_v31, %v70_v7 }
  0xd3   :  { %v139_v41 = vsel %vm44_vm0, %v135_v32, 0.0 }
  0xd4   :  { %v136_v42 = vadd.f32 %v133_v33, %v129_v35  ;;  %v137_v44 = vadd.f32 %v134_v34, %v130_v38  ;;  %v138_v47 = vsel %vm44_vm0, %v131_v39, 0.0 }
  0xd5   :  { %v140_v51 = vadd.f32 %v139_v41, %v138_v47 }
  0xd6   :  { %v142_v52 = vmul.f32 0.5, %v136_v42  ;;  %v143_v53 = vmul.f32 0.5, %v137_v44 }
  0xd7   :  { %v144_v55 = vmul.f32 0.5, %v140_v51 }
  0xd8   :  { %v145_v59 = vmul.f32 %v142_v52, %v142_v52  ;;  %v146_v60 = vmul.f32 %v143_v53, %v143_v53 }
  0xd9   :  { %v147_v62 = vmul.f32 %v144_v55, %v144_v55 }
  0xda   :  { %v148_v56 = vadd.f32 %v146_v60, %v145_v59  ;;  %v157_v17 = vmul.f32 2.0, %v145_v59 }
  0xdb   :  { %v149_v54 = vsel %vm44_vm0, %v147_v62, 0.0 }
  0xdc   :  { %v150_v58 = vadd.f32 %v149_v54, %v148_v56 }
  0xde   :  { %v151_v61 = vrot.slane %v150_v58, 4 }
  0xe0   :  { %v152_v57 = vadd.f32 %v151_v61, %v150_v58 }
  0xe2   :  { %v153_v7 = vrot.slane %v152_v57, 2 }
  0xe4   :  { %v154_v63 = vadd.f32 %v153_v7, %v152_v57 }
  0xe6   :  { %v155_v12 = vrot.slane %v154_v63, 1 }
  0xe8   :  { %v156_v16 = vadd.f32 %v155_v12, %v154_v63 }
  0xea   :  { %v158_v21 = vsub.f32 %v156_v16, %v157_v17 }
  0xec   :  { %v159_v22 = vand.u32 2147483647, %v158_v21 }
  0xee   :  { %v160_v3 = vmax.f32 %v159_v22, 1e-08 }
  0xf0   :  { %1182 = vrsqrt.f32 %v160_v3  ;;  %vm163_vm6 = vcmp.eq.f32.partialorder %v160_v3, inf  ;;  %v166_v25 = vand.u32 2147483648, %v160_v3  ;;  %vm165_vm7 = vcmp.eq.f32.partialorder %v160_v3, 0.0 }
  0xfa   :  { %v1183_v11 = vpop.eup %1182 }
  0xfb   :  { %v162_v23 = vmul.f32 %v1183_v11, %v160_v3 }
  0xfd   :  { %v164_v26 = vsel %vm163_vm6, %v160_v3, %v162_v23 }
  0xfe   :  { %v167_v27 = vsel %vm165_vm7, %v166_v25, %v164_v26 }
  0xff   :  { %v171_v30 = vrot.slane %v167_v27, %v1414_v40 }
 0x101   :  { %1184 = vrcp.f32 %v171_v30 }
 0x10b   :  { %v1185_v31 = vpop.eup %1184 }
 0x10c   :  { %v1457_v32 = vmul.f32 %v1185_v31, %v142_v52  ;;  %v1459_v33 = vmul.f32 %v1185_v31, %v143_v53  ;;  %v1461_v34 = vmul.f32 %v1185_v31, %v144_v55 }
 0x10e   :  { %v400_v35 = vadd.f32 %v1417_v43, %v1457_v32  ;;  %v403_v38 = vadd.f32 1.0, %v1457_v32  ;;  %v185_v39 = vmul.f32 %v1457_v32, %v1296_v0  ;;  %v186_v41 = vmul.f32 %v1457_v32, %v1301_v1 }
 0x10f   :  { %v187_v42 = vmul.f32 %v1457_v32, %v1306_v2  ;;  %v188_v44 = vmul.f32 %v1459_v33, %v1330_v8  ;;  %v189_v47 = vmul.f32 %v1459_v33, %v1335_v9  ;;  %v190_v43 = vmul.f32 %v1459_v33, %v1340_v10 }
 0x110   :  { %v407_v51 = vrot.slane %v403_v38, %v1414_v40  ;;  %v191_v52 = vmul.f32 %v1461_v34, %v1366_v18  ;;  %v192_v53 = vmul.f32 %v1461_v34, %v1371_v19  ;;  %v193_v55 = vmul.f32 %v1461_v34, %v1376_v20 }
 0x111   :  { %v221_v59 = vadd.f32 %v188_v44, %v185_v39  ;;  %v230_v60 = vadd.f32 %v189_v47, %v186_v41  ;;  %v239_v8 = vadd.f32 %v190_v43, %v187_v42  ;;  %v1489_v18 = vmul.f32 2.0, %v1457_v32 }
 0x112   :  { %1186 = vrcp.f32 %v407_v51  ;;  %v222_v9 = vsel %vm44_vm0, %v191_v52, 0.0  ;;  %v231_v62 = vsel %vm44_vm0, %v192_v53, 0.0  ;;  %v240_v10 = vsel %vm44_vm0, %v193_v55, 0.0 }
 0x113   :  { %v223_v56 = vadd.f32 %v222_v9, %v221_v59  ;;  %v232_v54 = vadd.f32 %v231_v62, %v230_v60  ;;  %v241_v58 = vadd.f32 %v240_v10, %v239_v8  ;;  %v176_v19 = vmul.f32 %v1457_v32, %v1313_v4 }
 0x114   :  { %v177_v20 = vmul.f32 %v1457_v32, %v1318_v5  ;;  %v178_v63 = vmul.f32 %v1457_v32, %v1323_v6  ;;  %v179_v12 = vmul.f32 %v1459_v33, %v1348_v13  ;;  %v180_v16 = vmul.f32 %v1459_v33, %v1353_v14 }
 0x115   :  { %v224_v61 = vrot.slane %v223_v56, 4  ;;  %v233_v57 = vrot.slane %v232_v54, 4  ;;  %v242_v7 = vrot.slane %v241_v58, 4  ;;  %v181_v17 = vmul.f32 %v1459_v33, %v1358_v15 }
 0x116   :  { %v182_v21 = vmul.f32 %v1461_v34, %v1386_v24  ;;  %v183_v23 = vmul.f32 %v1461_v34, %v1394_v28  ;;  %v184_v25 = vmul.f32 %v1461_v34, %v1399_v29  ;;  %v194_v26 = vadd.f32 %v179_v12, %v176_v19 }
 0x117   :  { %v225_v22 = vadd.f32 %v224_v61, %v223_v56  ;;  %v234_v3 = vadd.f32 %v233_v57, %v232_v54  ;;  %v243_v11 = vadd.f32 %v242_v7, %v241_v58  ;;  %v203_v27 = vadd.f32 %v180_v16, %v177_v20 }
 0x118   :  { %v195_v13 = vsel %vm44_vm0, %v182_v21, 0.0  ;;  %v204_v15 = vsel %vm44_vm0, %v183_v23, 0.0  ;;  %v212_v39 = vadd.f32 %v181_v17, %v178_v63  ;;  %v213_v41 = vsel %vm44_vm0, %v184_v25, 0.0 }
 0x119   :  { %v226_v14 = vrot.slane %v225_v22, 2  ;;  %v235_v30 = vrot.slane %v234_v3, 2  ;;  %v244_v31 = vrot.slane %v243_v11, 2  ;;  %v196_v38 = vadd.f32 %v195_v13, %v194_v26 }
 0x11a   :  { %v205_v24 = vadd.f32 %v204_v15, %v203_v27  ;;  %v252_v29 = vmul.f32 %v1489_v18, %v1296_v0  ;;  %v214_v52 = vadd.f32 %v213_v41, %v212_v39  ;;  %v253_v0 = vmul.f32 %v1489_v18, %v1301_v1 }
 0x11b   :  { %v227_v42 = vadd.f32 %v226_v14, %v225_v22  ;;  %v236_v44 = vadd.f32 %v235_v30, %v234_v3  ;;  %v245_v28 = vadd.f32 %v244_v31, %v243_v11  ;;  %v197_v43 = vrot.slane %v196_v38, 4 }
 0x11c   :  { %v1187_v47 = vpop.eup %1186  ;;  %v206_v51 = vrot.slane %v205_v24, 4  ;;  %v254_v54 = vmul.f32 %v1489_v18, %v1306_v2  ;;  %v249_v26 = vmul.f32 %v1489_v18, %v1313_v4  ;;  %v250_v13 = vmul.f32 %v1489_v18, %v1318_v5 }
 0x11d   :  { %v1514_v53 = vmul.f32 %v1187_v47, %v400_v35  ;;  %v1517_v55 = vmul.f32 %v1187_v47, %v1459_v33  ;;  %v1520_v59 = vmul.f32 %v1187_v47, %v1461_v34  ;;  %v228_v60 = vrot.slane %v227_v42, 1 }
 0x11e   :  { %v237_v8 = vrot.slane %v236_v44, 1  ;;  %v246_v9 = vrot.slane %v245_v28, 1  ;;  %v198_v62 = vadd.f32 %v197_v43, %v196_v38  ;;  %v207_v10 = vadd.f32 %v206_v51, %v205_v24 }
 0x11f   :  { %v229_v56 = vadd.f32 %v228_v60, %v227_v42  ;;  %v215_v35 = vrot.slane %v214_v52, 4  ;;  %v251_v5 = vmul.f32 %v1489_v18, %v1323_v6 }
 0x120   :  { %v238_v58 = vadd.f32 %v237_v8, %v236_v44  ;;  %v247_v19 = vadd.f32 %v246_v9, %v245_v28  ;;  %v199_v20 = vrot.slane %v198_v62, 2  ;;  %v208_v61 = vrot.slane %v207_v10, 2 }
 0x121   :  { %v258_v57 = vsub.f32 %v229_v56, %v252_v29  ;;  %v216_v7 = vadd.f32 %v215_v35, %v214_v52 }
 0x122   :  { %v259_v63 = vsub.f32 %v238_v58, %v253_v0  ;;  %v260_v12 = vsub.f32 %v247_v19, %v254_v54  ;;  %v200_v16 = vadd.f32 %v199_v20, %v198_v62  ;;  %v209_v17 = vadd.f32 %v208_v61, %v207_v10 }
 0x123   :  { %v264_v21 = vsub.f32 0.0, %v258_v57  ;;  %v217_v22 = vrot.slane %v216_v7, 2 }
 0x124   :  { %v265_v3 = vsub.f32 0.0, %v259_v63  ;;  %v266_v11 = vsub.f32 0.0, %v260_v12  ;;  %v201_v23 = vrot.slane %v200_v16, 1  ;;  %v210_v1 = vrot.slane %v209_v17, 1 }
 0x125   :  { %v1526_v25 = vmax.f32 %v264_v21, 1.0  ;;  %v218_v2 = vadd.f32 %v217_v22, %v216_v7 }
 0x126   :  { %v1532_v27 = vmax.f32 %v265_v3, 1.0  ;;  %v272_v14 = vmax.f32 %v266_v11, 1.0  ;;  %v202_v30 = vadd.f32 %v201_v23, %v200_v16  ;;  %v211_v31 = vadd.f32 %v210_v1, %v209_v17 }
 0x127   :  { %v276_v15 = vmul.f32 %v1526_v25, %v1526_v25  ;;  %v219_v38 = vrot.slane %v218_v2, 1 }
 0x128   :  { %v277_v24 = vmul.f32 %v1532_v27, %v1532_v27  ;;  %v278_v39 = vmul.f32 %v272_v14, %v272_v14  ;;  %v255_v41 = vsub.f32 %v202_v30, %v249_v26  ;;  %v256_v42 = vsub.f32 %v211_v31, %v250_v13 }
 0x129   :  { %v1150_v44 = vadd.f32 -1.0, %v276_v15  ;;  %v220_v4 = vadd.f32 %v219_v38, %v218_v2 }
 0x12a   :  { %v1151_v28 = vadd.f32 -1.0, %v277_v24  ;;  %v1152_v47 = vadd.f32 -1.0, %v278_v39  ;;  %v261_v29 = vsub.f32 0.0, %v255_v41  ;;  %v262_v43 = vsub.f32 0.0, %v256_v42 }
 0x12b   :  { %v288_v51 = vmax.f32 %v1150_v44, 1e-15  ;;  %v257_v52 = vsub.f32 %v220_v4, %v251_v5  ;;  %v352_v42 = vand.u32 127, %v120_v36 }
 0x12c   :  { %v289_v60 = vmax.f32 %v1151_v28, 1e-15  ;;  %v290_v8 = vmax.f32 %v1152_v47, 1e-15  ;;  %v1540_v9 = vmax.f32 %v261_v29, 1.0  ;;  %v1542_v62 = vmax.f32 %v262_v43, 1.0 }
 0x12d   :  { %1188 = vrsqrt.f32 %v288_v51  ;;  %v263_v10 = vsub.f32 0.0, %v257_v52  ;;  %vm314_vm8 = vcmp.eq.f32.partialorder %v288_v51, inf  ;;  %vm316_vm9 = vcmp.eq.f32.partialorder %v288_v51, 0.0 }
 0x12e   :  { %1190 = vrsqrt.f32 %v289_v60  ;;  %v273_v56 = vmul.f32 %v1540_v9, %v1540_v9  ;;  %v274_v6 = vmul.f32 %v1542_v62, %v1542_v62  ;;  %v317_v17 = vand.u32 2147483648, %v288_v51 }
 0x12f   :  { %1192 = vrsqrt.f32 %v290_v8  ;;  %v1548_v0 = vmax.f32 %v263_v10, 1.0  ;;  %vm321_vm10 = vcmp.eq.f32.partialorder %v289_v60, inf  ;;  %vm323_vm11 = vcmp.eq.f32.partialorder %v289_v60, 0.0 }
 0x130   :  { %v1147_v54 = vadd.f32 -1.0, %v273_v56  ;;  %v1148_v35 = vadd.f32 -1.0, %v274_v6  ;;  %v324_v3 = vand.u32 2147483648, %v289_v60  ;;  %vm328_vm12 = vcmp.eq.f32.partialorder %v290_v8, inf }
 0x131   :  { %v275_v58 = vmul.f32 %v1548_v0, %v1548_v0  ;;  %v331_v2 = vand.u32 2147483648, %v290_v8  ;;  %vm330_vm13 = vcmp.eq.f32.partialorder %v290_v8, 0.0 }
 0x132   :  { %v285_v19 = vmax.f32 %v1147_v54, 1e-15  ;;  %v286_v20 = vmax.f32 %v1148_v35, 1e-15 }
 0x133   :  { %v1149_v61 = vadd.f32 -1.0, %v275_v58 }
 0x134   :  { %1194 = vrsqrt.f32 %v285_v19  ;;  %vm293_vm14 = vcmp.eq.f32.partialorder %v285_v19, inf  ;;  %v296_v44 = vand.u32 2147483648, %v285_v19  ;;  %vm295_vm15 = vcmp.eq.f32.partialorder %v285_v19, 0.0 }
 0x135   :  { %1196 = vrsqrt.f32 %v286_v20  ;;  %v287_v12 = vmax.f32 %v1149_v61, 1e-15  ;;  %vm300_vm1 = vcmp.eq.f32.partialorder %v286_v20, inf  ;;  %v303_v28 = vand.u32 2147483648, %v286_v20 }
 0x136   :  { %vm302_vm2 = vcmp.eq.f32.partialorder %v286_v20, 0.0 }
 0x137   :  { %v1189_v57 = vpop.eup %1188  ;;  %1198 = vrsqrt.f32 %v287_v12  ;;  %vm307_vm3 = vcmp.eq.f32.partialorder %v287_v12, inf  ;;  %v310_v52 = vand.u32 2147483648, %v287_v12  ;;  %vm309_vm4 = vcmp.eq.f32.partialorder %v287_v12, 0.0 }
 0x138   :  { %v1191_v7 = vpop.eup %1190  ;;  %v313_v63 = vmul.f32 %v1189_v57, %v288_v51 }
 0x139   :  { %v1193_v16 = vpop.eup %1192  ;;  %v320_v21 = vmul.f32 %v1191_v7, %v289_v60 }
 0x13a   :  { %v315_v22 = vsel %vm314_vm8, %v288_v51, %v313_v63  ;;  %v327_v11 = vmul.f32 %v1193_v16, %v290_v8  ;;  %v354_v51 = vadd.s32 256, %v352_v42 }
 0x13b   :  { %v318_v23 = vsel %vm316_vm9, %v317_v17, %v315_v22  ;;  %v322_v1 = vsel %vm321_vm10, %v289_v60, %v320_v21 }
 0x13c   :  { %v325_v26 = vsel %vm323_vm11, %v324_v3, %v322_v1  ;;  %v329_v13 = vsel %vm328_vm12, %v290_v8, %v327_v11  ;;  %v336_v30 = vadd.f32 %v318_v23, %v1526_v25  ;;  %vm357_vm5 = vcmp.lt.s32.totalorder %v354_v51, 288 }
 0x13d   :  { %v332_v31 = vsel %vm330_vm13, %v331_v2, %v329_v13  ;;  %v337_v15 = vadd.f32 %v325_v26, %v1532_v27  ;;  %v10_v26 = vstv %s1931_s2 }
 0x13e   :  { %v338_v38 = vadd.f32 %v332_v31, %v272_v14  ;;  %1200 = vlog2.f32 %v336_v30  ;;  %v1195_v24 = vpop.eup %1194  ;;  %11 = vst [vmem:[#allocation2] sm:$0x1] %v10_v26 }
 0x13f   :  { %1202 = vlog2.f32 %v337_v15  ;;  %v1197_v39 = vpop.eup %1196  ;;  %v292_v41 = vmul.f32 %v1195_v24, %v285_v19 }
 0x140   :  { %1204 = vlog2.f32 %v338_v38  ;;  %v299_v4 = vmul.f32 %v1197_v39, %v286_v20 }
 0x141   :  { %v294_v5 = vsel %vm293_vm14, %v285_v19, %v292_v41  ;;  %v1199_v25 = vpop.eup %1198 }
 0x142   :  { %v297_v47 = vsel %vm295_vm15, %v296_v44, %v294_v5  ;;  %v301_v29 = vsel %vm300_vm1, %v286_v20, %v299_v4  ;;  %v306_v14 = vmul.f32 %v1199_v25, %v287_v12 }
 0x143   :  { %v304_v27 = vsel %vm302_vm2, %v303_v28, %v301_v29  ;;  %v333_v43 = vadd.f32 %v297_v47, %v1540_v9 }
 0x144   :  { %v334_v36 = vadd.f32 %v304_v27, %v1542_v62  ;;  %v308_v60 = vsel %vm307_vm3, %v287_v12, %v306_v14 }
 0x145   :  { %1206 = vlog2.f32 %v333_v43  ;;  %v311_v10 = vsel %vm309_vm4, %v310_v52, %v308_v60  ;;  %v383_v41 = vld [vmem:[#allocation2] sm:$0x1] }
 0x146   :  { %1208 = vlog2.f32 %v334_v36  ;;  %v335_v54 = vadd.f32 %v311_v10, %v1548_v0 }
 0x148   :  { %v1201_v8 = vpop.eup %1200  ;;  %1210 = vlog2.f32 %v335_v54 }
 0x149   :  { %v1203_v56 = vpop.eup %1202  ;;  %v346_v6 = vmul.f32 0.6931472, %v1201_v8 }
 0x14a   :  { %v1205_v35 = vpop.eup %1204  ;;  %v348_v58 = vmul.f32 0.6931472, %v1203_v56 }
 0x14b   :  { %v350_v19 = vmul.f32 0.6931472, %v1205_v35  ;;  %v371_v9 = vsel %vm44_vm0, %v346_v6, 0.0 }
 0x14c   :  { %v372_v20 = vsel %vm44_vm0, %v348_v58, 0.0 }
 0x14d   :  { %v363_v62 = vsel %vm357_vm5, %v350_v19, 0.0  ;;  %v373_v61 = vadd.f32 %v372_v20, %v371_v9 }
 0x14e   :  { %v374_v57 = vsel %vm44_vm0, %v363_v62, 0.0 }
 0x14f   :  { %v375_v7 = vadd.f32 %v374_v57, %v373_v61  ;;  %v1207_v63 = vpop.eup %1206 }
 0x150   :  { %v1209_v12 = vpop.eup %1208  ;;  %v340_v16 = vmul.f32 0.6931472, %v1207_v63 }
 0x151   :  { %376 = vadd.xlane.f32.xlu1 %v375_v7  ;;  %v342_v0 = vmul.f32 0.6931472, %v1209_v12 }
 0x152   :  { %v364_v17 = vsel %vm44_vm0, %v340_v16, 0.0  ;;  %v1211_v21 = vpop.eup %1210 }
 0x153   :  { %v365_v22 = vsel %vm44_vm0, %v342_v0, 0.0  ;;  %v344_v3 = vmul.f32 0.6931472, %v1211_v21 }
 0x154   :  { %v366_v11 = vadd.f32 %v365_v22, %v364_v17 }
 0x155   :  { %v360_v23 = vsel %vm357_vm5, %v344_v3, 0.0 }
 0x156   :  { %v367_v1 = vsel %vm44_vm0, %v360_v23, 0.0 }
 0x157   :  { %v368_v2 = vadd.f32 %v367_v1, %v366_v11 }
 0x159   :  { %369 = vadd.xlane.f32.xlu0 %v368_v2 }
 0x1de   :  { %v377_v13 = vpop.xlane.xlu1 %376 }
 0x1df   :  { %v379_v30 = vsel %vm44_vm0, %v377_v13, 0.0 }
 0x1e6   :  { %v370_v31 = vpop.xlane.xlu0 %369 }
 0x1e7   :  { %v378_v15 = vsel %vm44_vm0, %v370_v31, 0.0 }
 0x1e8   :  { %v380_v38 = vadd.f32 %v379_v30, %v378_v15 }
 0x1ea   :  { %v382_v24 = vmul.f32 0.0017361111, %v380_v38 }
 0x1ec   :  { %v384_v39 = vadd.f32 1e-05, %v382_v24 }
 0x1ee   :  { %1212 = vrcp.f32 %v384_v39 }
 0x1f8   :  { %v1213_v42 = vpop.eup %1212 }
 0x1f9   :  { %v1571_v44 = vmul.f32 %v1213_v42, %v383_v41 }
 0x1fa LB: > { %v1267_v4 = vmov 0   ;;  %v727_v5 = vmul.f32 2.0, %v1410_v37  ;;  %s1159_s2 = smul.u32 72, %s1264_s6  ;;  %vm966_vm3 = vcmask 1043456   ;;  %vm991_vm4 = vcmask 1042432   ;;  %s1264_s6 = sphi %s1573_s6, %s429_s6  }
 0x1fb   : > { %1214 = vset.pattern.permute.xlu0 %v1267_v4  ;;  %1215 = vset.pattern.permute.xlu1 %v1267_v4  ;;  %vm1088_vm5 = vcmask 1041408   ;;  %s1161_s13 = smul.u32 12, %s1264_s6  ;;  %s429_s6 = sadd.s32 1, %s1264_s6  }
 0x1fc   : > { %609 = vperm.xlu0 %1214, %v1571_v44   ;;  %683 = vperm.xlu1 %1215, %v1424_v45   ;;  %s432_s9 = scalar_lea.vmem %s1929_s0, %s1159_s2  ;;  %s938_s12 = scalar_lea.vmem %s1932_s3, %s1159_s2 }
 0x1fd   : > { %v1592_v28 = vld [vmem:[%s432_s9] sm:$0xff]  ;;  %v1594_v25 = vld [vmem:[%s432_s9 + $0x18] sm:$0xff]  ;;  %v1596_v47 = vld [vmem:[%s432_s9 + $0x8] sm:$0xff]  ;;  %s1125_s16 = scalar_lea.vmem %s1933_s4, %s1161_s13  ;;  %p426_p0 = scmp.ge.s32.totalorder %s429_s6, 2  }
 0x1fe   : > { %v1598_v29 = vld [vmem:[%s432_s9 + $0x20] sm:$0xff]  ;;  %v1600_v27 = vld [vmem:[%s432_s9 + $0x30] sm:$0x1]  ;;  %v1604_v43 = vld [vmem:[%s432_s9 + $0x28] sm:$0xff]  ;;  %v442_v36 = vmul.f32 %v1592_v28, %v1457_v32  ;;  %v445_v60 = vmul.f32 %v1594_v25, %v1459_v33  ;;  %v443_v8 = vmul.f32 %v1596_v47, %v1457_v32  ;;  %v478_v24 = vmul.f32 %v1592_v28, %v1489_v18 }
 0x1ff   : > { %v1602_v14 = vld [vmem:[%s432_s9 + $0x10] sm:$0xff]  ;;  %v1606_v51 = vld [vmem:[%s432_s9 + $0x38] sm:$0x1]  ;;  %v1608_v52 = vld [vmem:[%s432_s9 + $0x40] sm:$0x1]  ;;  %v446_v10 = vmul.f32 %v1598_v29, %v1459_v33  ;;  %v448_v56 = vmul.f32 %v1600_v27, %v1461_v34  ;;  %v447_v54 = vmul.f32 %v1604_v43, %v1459_v33  ;;  %v479_v41 = vmul.f32 %v1596_v47, %v1489_v18 }
 0x200   : > { %678 = vperm.xlu0 %1214, %v1410_v37   ;;  %688 = vperm.xlu1 %1215, %v1429_v46   ;;  %v444_v6 = vmul.f32 %v1602_v14, %v1457_v32  ;;  %v449_v35 = vmul.f32 %v1606_v51, %v1461_v34  ;;  %v450_v58 = vmul.f32 %v1608_v52, %v1461_v34 }
 0x201   : > { %v451_v19 = vadd.f32 %v445_v60, %v442_v36  ;;  %v452_v9 = vsel %vm44_vm0, %v448_v56, 0.0  ;;  %v460_v20 = vadd.f32 %v446_v10, %v443_v8  ;;  %v480_v4 = vmul.f32 %v1602_v14, %v1489_v18 }
 0x202   : > { %v461_v62 = vsel %vm44_vm0, %v449_v35, 0.0  ;;  %v469_v61 = vadd.f32 %v447_v54, %v444_v6  ;;  %v470_v57 = vsel %vm44_vm0, %v450_v58, 0.0 }
 0x203   : > { %v453_v7 = vadd.f32 %v452_v9, %v451_v19  ;;  %v462_v63 = vadd.f32 %v461_v62, %v460_v20 }
 0x204   : > { %730 = vperm.xlu0 %1214, %v727_v5   ;;  %753 = vperm.xlu1 %1215, %v1431_v48   ;;  %v471_v12 = vadd.f32 %v470_v57, %v469_v61 }
 0x205   : > { %v454_v16 = vrot.slane %v453_v7, 4  ;;  %v463_v0 = vrot.slane %v462_v63, 4 }
 0x206   : > { %v472_v17 = vrot.slane %v471_v12, 4 }
 0x207   : > { %v455_v21 = vadd.f32 %v454_v16, %v453_v7  ;;  %v464_v22 = vadd.f32 %v463_v0, %v462_v63 }
 0x208   : > { %758 = vperm.xlu0 %1214, %v1434_v49   ;;  %763 = vperm.xlu1 %1215, %v1437_v50   ;;  %v473_v3 = vadd.f32 %v472_v17, %v471_v12 }
 0x209   : > { %v456_v11 = vrot.slane %v455_v21, 2  ;;  %v465_v23 = vrot.slane %v464_v22, 2 }
 0x20a   : > { %v474_v1 = vrot.slane %v473_v3, 2 }
 0x20b   : > { %v457_v2 = vadd.f32 %v456_v11, %v455_v21  ;;  %v466_v26 = vadd.f32 %v465_v23, %v464_v22 }
 0x20c   : > { %v475_v13 = vadd.f32 %v474_v1, %v473_v3 }
 0x20d   : > { %v458_v30 = vrot.slane %v457_v2, 1  ;;  %v467_v31 = vrot.slane %v466_v26, 1 }
 0x20e   : > { %v476_v15 = vrot.slane %v475_v13, 1 }
 0x20f   : > { %v459_v38 = vadd.f32 %v458_v30, %v457_v2  ;;  %v468_v39 = vadd.f32 %v467_v31, %v466_v26 }
 0x210   : > { %v477_v42 = vadd.f32 %v476_v15, %v475_v13 }
 0x211   : > { %v481_v5 = vsub.f32 %v459_v38, %v478_v24  ;;  %v482_v36 = vsub.f32 %v468_v39, %v479_v41 }
 0x212   : > { %v483_v60 = vsub.f32 %v477_v42, %v480_v4 }
 0x213   : > { %v532_v8 = vrot.slane %v481_v5, %v1414_v40  ;;  %v536_v10 = vrot.slane %v482_v36, %v1414_v40  ;;  %v484_v6 = vsub.f32 0.0, %v481_v5  ;;  %v485_v54 = vsub.f32 0.0, %v482_v36 }
 0x214   : > { %v540_v56 = vrot.slane %v483_v60, %v1414_v40  ;;  %v486_v19 = vsub.f32 0.0, %v483_v60 }
 0x215   : > { %v541_v35 = vmul.f32 %v532_v8, %v1457_v32  ;;  %v544_v58 = vmul.f32 %v532_v8, %v1459_v33  ;;  %v542_v9 = vmul.f32 %v536_v10, %v1457_v32  ;;  %v545_v20 = vmul.f32 %v536_v10, %v1459_v33 }
 0x216   : > { %v547_v62 = vmul.f32 %v532_v8, %v1461_v34  ;;  %v543_v61 = vmul.f32 %v540_v56, %v1457_v32  ;;  %v546_v57 = vmul.f32 %v540_v56, %v1459_v33  ;;  %v548_v7 = vmul.f32 %v536_v10, %v1461_v34 }
 0x217   : > { %v1648_v63 = vmax.f32 %v484_v6, 1.0  ;;  %v549_v12 = vmul.f32 %v540_v56, %v1461_v34  ;;  %v1651_v16 = vmax.f32 %v485_v54, 1.0  ;;  %v1654_v0 = vadd.f32 %v541_v35, %v1592_v28 }
 0x218   : > { %v1657_v17 = vadd.f32 %v544_v58, %v1594_v25  ;;  %v1659_v21 = vmax.f32 %v486_v19, 1.0  ;;  %v1662_v22 = vadd.f32 %v542_v9, %v1596_v47  ;;  %v1665_v3 = vadd.f32 %v545_v20, %v1598_v29 }
 0x219   : > { %v1668_v11 = vadd.f32 %v547_v62, %v1600_v27  ;;  %v1671_v23 = vadd.f32 %v543_v61, %v1602_v14  ;;  %v1674_v28 = vadd.f32 %v546_v57, %v1604_v43  ;;  %v1677_v25 = vadd.f32 %v548_v7, %v1606_v51 }
 0x21a   : > { %v490_v1 = vmul.f32 %v1648_v63, %v1648_v63  ;;  %v1682_v47 = vadd.f32 %v549_v12, %v1608_v52  ;;  %v491_v29 = vmul.f32 %v1651_v16, %v1651_v16  ;;  %v559_v27 = vmul.f32 %v1654_v0, %v1654_v0 }
 0x21b   : > { %v562_v14 = vmul.f32 %v1657_v17, %v1657_v17  ;;  %v492_v43 = vmul.f32 %v1659_v21, %v1659_v21  ;;  %v560_v51 = vmul.f32 %v1662_v22, %v1662_v22  ;;  %v563_v2 = vmul.f32 %v1665_v3, %v1665_v3 }
 0x21c   : > { %v565_v52 = vmul.f32 %v1668_v11, %v1668_v11  ;;  %v561_v26 = vmul.f32 %v1671_v23, %v1671_v23  ;;  %v564_v13 = vmul.f32 %v1674_v28, %v1674_v28  ;;  %v566_v30 = vmul.f32 %v1677_v25, %v1677_v25 }
 0x21d   : > { %v1154_v31 = vadd.f32 -1.0, %v490_v1  ;;  %v567_v15 = vmul.f32 %v1682_v47, %v1682_v47  ;;  %v1155_v38 = vadd.f32 -1.0, %v491_v29  ;;  %v568_v24 = vadd.f32 %v562_v14, %v559_v27 }
 0x21e   : > { %v1156_v39 = vadd.f32 -1.0, %v492_v43  ;;  %v569_v41 = vsel %vm44_vm0, %v565_v52, 0.0  ;;  %v577_v42 = vadd.f32 %v563_v2, %v560_v51  ;;  %v578_v4 = vsel %vm44_vm0, %v566_v30, 0.0 }
 0x21f   : > { %v586_v5 = vadd.f32 %v564_v13, %v561_v26  ;;  %v496_v36 = vmax.f32 %v1154_v31, 1e-15  ;;  %v587_v60 = vsel %vm44_vm0, %v567_v15, 0.0  ;;  %v497_v8 = vmax.f32 %v1155_v38, 1e-15 }
 0x220   : > { %v570_v10 = vadd.f32 %v569_v41, %v568_v24  ;;  %v498_v56 = vmax.f32 %v1156_v39, 1e-15  ;;  %v579_v6 = vadd.f32 %v578_v4, %v577_v42  ;;  %v595_v15 = vmul.f32 2.0, %v1654_v0 }
 0x221   : > { %v588_v54 = vadd.f32 %v587_v60, %v586_v5  ;;  %1216 = vrsqrt.f32 %v496_v36  ;;  %vm501_vm6 = vcmp.eq.f32.partialorder %v496_v36, inf  ;;  %vm508_vm7 = vcmp.eq.f32.partialorder %v497_v8, inf }
 0x222   : > { %1218 = vrsqrt.f32 %v497_v8  ;;  %v571_v35 = vrot.slane %v570_v10, 4  ;;  %v580_v58 = vrot.slane %v579_v6, 4  ;;  %vm503_vm8 = vcmp.eq.f32.partialorder %v496_v36, 0.0 }
 0x223   : > { %1220 = vrsqrt.f32 %v498_v56  ;;  %v589_v19 = vrot.slane %v588_v54, 4  ;;  %v504_v26 = vand.u32 2147483648, %v496_v36  ;;  %vm510_vm9 = vcmp.eq.f32.partialorder %v497_v8, 0.0 }
 0x224   : > { %v572_v9 = vadd.f32 %v571_v35, %v570_v10  ;;  %v581_v20 = vadd.f32 %v580_v58, %v579_v6  ;;  %vm515_vm10 = vcmp.eq.f32.partialorder %v498_v56, inf  ;;  %v511_v30 = vand.u32 2147483648, %v497_v8 }
 0x225   : > { %v590_v62 = vadd.f32 %v589_v19, %v588_v54  ;;  %v518_v24 = vand.u32 2147483648, %v498_v56  ;;  %v596_v41 = vmul.f32 2.0, %v1662_v22  ;;  %vm517_vm11 = vcmp.eq.f32.partialorder %v498_v56, 0.0 }
 0x226   : > { %v573_v61 = vrot.slane %v572_v9, 2  ;;  %v582_v7 = vrot.slane %v581_v20, 2  ;;  %v597_v5 = vmul.f32 2.0, %v1671_v23  ;;  %v598_v54 = vmul.f32 %v595_v15, %v1654_v0 }
 0x227   : > { %v591_v1 = vrot.slane %v590_v62, 2  ;;  %v599_v19 = vmul.f32 %v596_v41, %v1662_v22 }
 0x228   : > { %v574_v14 = vadd.f32 %v573_v61, %v572_v9  ;;  %v583_v51 = vadd.f32 %v582_v7, %v581_v20  ;;  %v600_v20 = vmul.f32 %v597_v5, %v1671_v23 }
 0x229   : > { %v592_v52 = vadd.f32 %v591_v1, %v590_v62 }
 0x22a   : > { %v575_v31 = vrot.slane %v574_v14, 1  ;;  %v584_v39 = vrot.slane %v583_v51, 1 }
 0x22b   : > { %v1217_v57 = vpop.eup %1216  ;;  %v593_v4 = vrot.slane %v592_v52, 1 }
 0x22c   : > { %v1219_v12 = vpop.eup %1218  ;;  %v500_v27 = vmul.f32 %v1217_v57, %v496_v36  ;;  %v576_v6 = vadd.f32 %v575_v31, %v574_v14  ;;  %v585_v58 = vadd.f32 %v584_v39, %v583_v51 }
 0x22d   : > { %v1221_v29 = vpop.eup %1220  ;;  %v507_v43 = vmul.f32 %v1219_v12, %v497_v8  ;;  %v594_v9 = vadd.f32 %v593_v4, %v592_v52 }
 0x22e   : > { %v514_v2 = vmul.f32 %v1221_v29, %v498_v56  ;;  %v502_v13 = vsel %vm501_vm6, %v496_v36, %v500_v27  ;;  %v601_v61 = vsub.f32 %v576_v6, %v598_v54  ;;  %v602_v36 = vsub.f32 %v585_v58, %v599_v19 }
 0x22f   : > { %v509_v38 = vsel %vm508_vm7, %v497_v8, %v507_v43  ;;  %v505_v60 = vsel %vm503_vm8, %v504_v26, %v502_v13  ;;  %v603_v57 = vsub.f32 %v594_v9, %v600_v20 }
 0x230   : > { %v516_v42 = vsel %vm515_vm10, %v498_v56, %v514_v2  ;;  %v512_v10 = vsel %vm510_vm9, %v511_v30, %v509_v38  ;;  %v520_v8 = vadd.f32 %v505_v60, %v1648_v63  ;;  %v604_v7 = vmax.f32 %v601_v61, 1e-08 }
 0x231   : > { %v519_v35 = vsel %vm517_vm11, %v518_v24, %v516_v42  ;;  %v521_v56 = vadd.f32 %v512_v10, %v1651_v16  ;;  %v605_v12 = vmax.f32 %v602_v36, 1e-08  ;;  %v606_v1 = vmax.f32 %v603_v57, 1e-08 }
 0x232   : > { %v522_v62 = vadd.f32 %v519_v35, %v1659_v21  ;;  %1222 = vlog2.f32 %v520_v8 }
 0x233   : > { %1224 = vlog2.f32 %v521_v56 }
 0x234   : > { %1226 = vlog2.f32 %v522_v62 }
 0x235   : > { %1228 = vrsqrt.f32 %v604_v7 }
 0x236   : > { %1230 = vrsqrt.f32 %v605_v12 }
 0x237   : > { %1232 = vrsqrt.f32 %v606_v1 }
 0x23c   : > { %v1223_v63 = vpop.eup %1222 }
 0x23d   : > { %v1225_v29 = vpop.eup %1224  ;;  %v524_v14 = vmul.f32 0.6931472, %v1223_v63 }
 0x23e   : > { %v1227_v27 = vpop.eup %1226  ;;  %v526_v43 = vmul.f32 0.6931472, %v1225_v29 }
 0x23f   : > { %v528_v16 = vmul.f32 0.6931472, %v1227_v27  ;;  %v1229_v51 = vpop.eup %1228 }
 0x240   : > { %v1231_v2 = vpop.eup %1230 }
 0x241   : > { %v1233_v26 = vpop.eup %1232 }
 0x27b   : > { %v610_v21 = vpop.permute.xlu0 %609  ;;  %v1734_v9 = vpop.permute.xlu1 %683 }
 0x27c   : > { %v615_v52 = vrot.slane %v610_v21, %v1414_v40 }
 0x27e   : > { %v616_v13 = vmul.f32 %v615_v52, %v524_v14  ;;  %v617_v30 = vmul.f32 %v615_v52, %v526_v43  ;;  %v618_v31 = vmul.f32 %v615_v52, %v528_v16 }
 0x27f   : > { %v1752_v57 = vpop.permute.xlu0 %678  ;;  %v1770_v16 = vpop.permute.xlu1 %688 }
 0x280   : > { %v622_v15 = vmul.f32 %v1229_v51, %v616_v13  ;;  %v623_v38 = vmul.f32 %v1231_v2, %v617_v30  ;;  %v624_v24 = vmul.f32 %v1233_v26, %v618_v31 }
 0x282   : > { %v628_v39 = vrot.slane %v622_v15, %v1414_v40  ;;  %v632_v41 = vrot.slane %v623_v38, %v1414_v40  ;;  %v636_v42 = vrot.slane %v624_v24, %v1414_v40 }
 0x284   : > { %v637_v4 = vmul.f32 %v628_v39, %v1654_v0  ;;  %v638_v5 = vmul.f32 %v632_v41, %v1662_v22  ;;  %v640_v60 = vmul.f32 %v628_v39, %v1657_v17  ;;  %v639_v10 = vmul.f32 %v636_v42, %v1671_v23 }
 0x285   : > { %v641_v6 = vmul.f32 %v632_v41, %v1665_v3  ;;  %v642_v54 = vmul.f32 %v636_v42, %v1674_v28  ;;  %v643_v19 = vmul.f32 %v628_v39, %v1668_v11  ;;  %v644_v8 = vmul.f32 %v632_v41, %v1677_v25 }
 0x286   : > { %v649_v35 = vrot.slane %v637_v4, %v1414_v40  ;;  %v653_v58 = vrot.slane %v638_v5, %v1414_v40  ;;  %v645_v0 = vmul.f32 %v636_v42, %v1682_v47  ;;  %v657_v17 = vrot.slane %v639_v10, %v1414_v40 }
 0x288   : > { %v658_v22 = vmul.f32 %v649_v35, %v1514_v53  ;;  %v659_v3 = vmul.f32 %v653_v58, %v1514_v53  ;;  %v661_v23 = vmul.f32 %v649_v35, %v1517_v55  ;;  %v662_v28 = vmul.f32 %v653_v58, %v1517_v55 }
 0x289   : > { %v660_v20 = vmul.f32 %v657_v17, %v1514_v53  ;;  %v663_v11 = vmul.f32 %v657_v17, %v1517_v55  ;;  %v664_v25 = vmul.f32 %v649_v35, %v1520_v59  ;;  %v665_v47 = vmul.f32 %v653_v58, %v1520_v59 }
 0x28a   : > { %v666_v56 = vmul.f32 %v657_v17, %v1520_v59  ;;  %v1746_v62 = vsub.f32 %v637_v4, %v658_v22  ;;  %v1748_v61 = vsub.f32 %v638_v5, %v659_v3  ;;  %v1750_v36 = vsub.f32 %v640_v60, %v661_v23  ;;  %v731_v23 = vpop.permute.xlu0 %730 }
 0x28b   : > { %v1754_v7 = vsub.f32 %v639_v10, %v660_v20  ;;  %v1756_v12 = vsub.f32 %v641_v6, %v662_v28  ;;  %v1758_v1 = vsub.f32 %v642_v54, %v663_v11  ;;  %v1760_v63 = vsub.f32 %v643_v19, %v664_v25 }
 0x28c   : > { %v1762_v29 = vsub.f32 %v644_v8, %v665_v47  ;;  %v1764_v27 = vsub.f32 %v645_v0, %v666_v56  ;;  %v691_v14 = vmul.f32 %v1752_v57, %v1746_v62  ;;  %v692_v43 = vmul.f32 %v1752_v57, %v1748_v61 }
 0x28d   : > { %v693_v51 = vmul.f32 %v1752_v57, %v1754_v7  ;;  %v694_v21 = vmul.f32 %v1734_v9, %v1750_v36  ;;  %v695_v2 = vmul.f32 %v1734_v9, %v1756_v12  ;;  %v696_v52 = vmul.f32 %v1734_v9, %v1758_v1 }
 0x28e   : > { %v697_v26 = vmul.f32 %v1770_v16, %v1760_v63  ;;  %v698_v13 = vmul.f32 %v1770_v16, %v1762_v29  ;;  %v699_v30 = vmul.f32 %v1770_v16, %v1764_v27  ;;  %v733_v25 = vmul.f32 %v731_v23, %v1746_v62 }
 0x28f   : > { %v700_v31 = vadd.f32 %v694_v21, %v691_v14  ;;  %v709_v15 = vadd.f32 %v695_v2, %v692_v43  ;;  %v718_v38 = vadd.f32 %v696_v52, %v693_v51  ;;  %v734_v47 = vmul.f32 %v731_v23, %v1748_v61  ;;  %v754_v21 = vpop.permute.xlu1 %753 }
 0x290   : > { %v701_v24 = vsel %vm44_vm0, %v697_v26, 0.0  ;;  %v710_v39 = vsel %vm44_vm0, %v698_v13, 0.0  ;;  %v719_v41 = vsel %vm44_vm0, %v699_v30, 0.0  ;;  %v735_v51 = vmul.f32 %v731_v23, %v1754_v7 }
 0x291   : > { %v702_v42 = vadd.f32 %v701_v24, %v700_v31  ;;  %v711_v4 = vadd.f32 %v710_v39, %v709_v15  ;;  %v720_v5 = vadd.f32 %v719_v41, %v718_v38  ;;  %v759_v15 = vpop.permute.xlu0 %758 }
 0x293   : > { %v703_v60 = vrot.slane %v702_v42, 4  ;;  %v712_v10 = vrot.slane %v711_v4, 4  ;;  %v721_v6 = vrot.slane %v720_v5, 4 }
 0x295   : > { %v704_v54 = vadd.f32 %v703_v60, %v702_v42  ;;  %v713_v35 = vadd.f32 %v712_v10, %v711_v4  ;;  %v722_v58 = vadd.f32 %v721_v6, %v720_v5  ;;  %v764_v42 = vpop.permute.xlu1 %763 }
 0x297   : > { %v705_v19 = vrot.slane %v704_v54, 2  ;;  %v714_v8 = vrot.slane %v713_v35, 2  ;;  %v723_v0 = vrot.slane %v722_v58, 2 }
 0x299   : > { %v706_v17 = vadd.f32 %v705_v19, %v704_v54  ;;  %v715_v22 = vadd.f32 %v714_v8, %v713_v35  ;;  %v724_v3 = vadd.f32 %v723_v0, %v722_v58 }
 0x29b   : > { %v707_v28 = vrot.slane %v706_v17, 1  ;;  %v716_v20 = vrot.slane %v715_v22, 1  ;;  %v725_v11 = vrot.slane %v724_v3, 1 }
 0x29d   : > { %v708_v56 = vadd.f32 %v707_v28, %v706_v17  ;;  %v717_v14 = vadd.f32 %v716_v20, %v715_v22  ;;  %v726_v43 = vadd.f32 %v725_v11, %v724_v3 }
 0x29f   : > { %v736_v2 = vsub.f32 %v708_v56, %v733_v25  ;;  %v737_v52 = vsub.f32 %v717_v14, %v734_v47  ;;  %v738_v26 = vsub.f32 %v726_v43, %v735_v51 }
 0x2a1   : > { %v742_v13 = vrot.slane %v736_v2, %v1414_v40  ;;  %v746_v30 = vrot.slane %v737_v52, %v1414_v40  ;;  %v750_v31 = vrot.slane %v738_v26, %v1414_v40 }
 0x2a3   : > { %v766_v38 = vmul.f32 %v754_v21, %v742_v13  ;;  %v767_v24 = vmul.f32 %v754_v21, %v746_v30  ;;  %v768_v39 = vmul.f32 %v754_v21, %v750_v31  ;;  %v769_v41 = vmul.f32 %v759_v15, %v742_v13 }
 0x2a4   : > { %v770_v4 = vmul.f32 %v759_v15, %v746_v30  ;;  %v771_v5 = vmul.f32 %v759_v15, %v750_v31  ;;  %v772_v60 = vmul.f32 %v764_v42, %v742_v13  ;;  %v773_v8 = vmul.f32 %v764_v42, %v746_v30 }
 0x2a5   : > { %v1796_v10 = vadd.f32 %v766_v38, %v1746_v62  ;;  %v1799_v6 = vadd.f32 %v767_v24, %v1748_v61  ;;  %v1802_v54 = vadd.f32 %v768_v39, %v1754_v7  ;;  %v1805_v35 = vadd.f32 %v769_v41, %v1750_v36 }
 0x2a6   : > { %v1808_v58 = vadd.f32 %v770_v4, %v1756_v12  ;;  %v1811_v19 = vadd.f32 %v771_v5, %v1758_v1  ;;  %v774_v0 = vmul.f32 %v764_v42, %v750_v31  ;;  %v1816_v61 = vadd.f32 %v772_v60, %v1760_v63 }
 0x2a7   : > { %v784_v62 = vmul.f32 %v1796_v10, %v1796_v10  ;;  %v785_v7 = vmul.f32 %v1799_v6, %v1799_v6  ;;  %v786_v36 = vmul.f32 %v1802_v54, %v1802_v54  ;;  %v787_v12 = vmul.f32 %v1805_v35, %v1805_v35 }
 0x2a8   : > { %v788_v1 = vmul.f32 %v1808_v58, %v1808_v58  ;;  %v789_v17 = vmul.f32 %v1811_v19, %v1811_v19  ;;  %v1829_v3 = vadd.f32 %v773_v8, %v1762_v29  ;;  %v1832_v63 = vadd.f32 %v774_v0, %v1764_v27 }
 0x2a9   : > { %v793_v22 = vadd.f32 %v787_v12, %v784_v62  ;;  %v790_v20 = vmul.f32 %v1816_v61, %v1816_v61  ;;  %v820_v38 = vmul.f32 2.0, %v1796_v10  ;;  %v821_v39 = vmul.f32 2.0, %v1799_v6 }
 0x2aa   : > { %v802_v23 = vadd.f32 %v788_v1, %v785_v7  ;;  %v811_v28 = vadd.f32 %v789_v17, %v786_v36  ;;  %v791_v11 = vmul.f32 %v1829_v3, %v1829_v3  ;;  %v792_v25 = vmul.f32 %v1832_v63, %v1832_v63 }
 0x2ab   : > { %v794_v47 = vsel %vm44_vm0, %v790_v20, 0.0  ;;  %v822_v41 = vmul.f32 2.0, %v1802_v54  ;;  %v823_v0 = vmul.f32 %v820_v38, %v1796_v10  ;;  %v824_v7 = vmul.f32 %v821_v39, %v1799_v6 }
 0x2ac   : > { %v795_v56 = vadd.f32 %v794_v47, %v793_v22  ;;  %v803_v29 = vsel %vm44_vm0, %v791_v11, 0.0  ;;  %v812_v14 = vsel %vm44_vm0, %v792_v25, 0.0 }
 0x2ad   : > { %v804_v27 = vadd.f32 %v803_v29, %v802_v23  ;;  %v813_v43 = vadd.f32 %v812_v14, %v811_v28  ;;  %v825_v36 = vmul.f32 %v822_v41, %v1802_v54 }
 0x2ae   : > { %v796_v51 = vrot.slane %v795_v56, 4 }
 0x2af   : > { %v805_v21 = vrot.slane %v804_v27, 4  ;;  %v814_v2 = vrot.slane %v813_v43, 4 }
 0x2b0   : > { %v797_v52 = vadd.f32 %v796_v51, %v795_v56 }
 0x2b1   : > { %v806_v26 = vadd.f32 %v805_v21, %v804_v27  ;;  %v815_v13 = vadd.f32 %v814_v2, %v813_v43 }
 0x2b2   : > { %v798_v30 = vrot.slane %v797_v52, 2 }
 0x2b3   : > { %v807_v31 = vrot.slane %v806_v26, 2  ;;  %v816_v15 = vrot.slane %v815_v13, 2 }
 0x2b4   : > { %v799_v24 = vadd.f32 %v798_v30, %v797_v52 }
 0x2b5   : > { %v808_v42 = vadd.f32 %v807_v31, %v806_v26  ;;  %v817_v4 = vadd.f32 %v816_v15, %v815_v13 }
 0x2b6   : > { %v800_v5 = vrot.slane %v799_v24, 1 }
 0x2b7   : > { %v809_v60 = vrot.slane %v808_v42, 1  ;;  %v818_v8 = vrot.slane %v817_v4, 1 }
 0x2b8   : > { %v801_v62 = vadd.f32 %v800_v5, %v799_v24 }
 0x2b9   : > { %v810_v12 = vadd.f32 %v809_v60, %v808_v42  ;;  %v819_v1 = vadd.f32 %v818_v8, %v817_v4 }
 0x2ba   : > { %v826_v17 = vsub.f32 %v801_v62, %v823_v0 }
 0x2bb   : > { %v827_v22 = vsub.f32 %v810_v12, %v824_v7  ;;  %v828_v23 = vsub.f32 %v819_v1, %v825_v36 }
 0x2bc   : > { %v829_v28 = vmax.f32 %v826_v17, 1e-08 }
 0x2bd   : > { %v830_v20 = vmax.f32 %v827_v22, 1e-08  ;;  %v831_v11 = vmax.f32 %v828_v23, 1e-08 }
 0x2be   : > { %1234 = vrsqrt.f32 %v829_v28  ;;  %vm834_vm12 = vcmp.eq.f32.partialorder %v829_v28, inf  ;;  %vm836_vm13 = vcmp.eq.f32.partialorder %v829_v28, 0.0  ;;  %v837_v14 = vand.u32 2147483648, %v829_v28 }
 0x2bf   : > { %1236 = vrsqrt.f32 %v830_v20  ;;  %vm841_vm14 = vcmp.eq.f32.partialorder %v830_v20, inf  ;;  %vm843_vm15 = vcmp.eq.f32.partialorder %v830_v20, 0.0  ;;  %v844_v51 = vand.u32 2147483648, %v830_v20 }
 0x2c0   : > { %1238 = vrsqrt.f32 %v831_v11  ;;  %vm848_vm1 = vcmp.eq.f32.partialorder %v831_v11, inf  ;;  %vm850_vm2 = vcmp.eq.f32.partialorder %v831_v11, 0.0  ;;  %v851_v26 = vand.u32 2147483648, %v831_v11 }
 0x2c8   : > { %v1235_v25 = vpop.eup %1234 }
 0x2c9   : > { %v1237_v47 = vpop.eup %1236  ;;  %v833_v56 = vmul.f32 %v1235_v25, %v829_v28 }
 0x2ca   : > { %v1239_v29 = vpop.eup %1238  ;;  %v840_v27 = vmul.f32 %v1237_v47, %v830_v20 }
 0x2cb   : > { %v835_v43 = vsel %vm834_vm12, %v829_v28, %v833_v56  ;;  %v847_v21 = vmul.f32 %v1239_v29, %v831_v11 }
 0x2cc   : > { %v838_v2 = vsel %vm836_vm13, %v837_v14, %v835_v43  ;;  %v842_v52 = vsel %vm841_vm14, %v830_v20, %v840_v27 }
 0x2cd   : > { %v845_v13 = vsel %vm843_vm15, %v844_v51, %v842_v52  ;;  %v849_v30 = vsel %vm848_vm1, %v831_v11, %v847_v21  ;;  %v853_v31 = vmul.f32 1.442695, %v838_v2  ;;  %v859_v15 = vsub.f32 0.0, %v838_v2 }
 0x2ce   : > { %v852_v38 = vsel %vm850_vm2, %v851_v26, %v849_v30  ;;  %v855_v24 = vmul.f32 1.442695, %v845_v13  ;;  %v860_v39 = vsub.f32 0.0, %v845_v13 }
 0x2cf   : > { %1240 = vpow2.f32 %v853_v31  ;;  %v857_v41 = vmul.f32 1.442695, %v852_v38  ;;  %v861_v42 = vsub.f32 0.0, %v852_v38  ;;  %v862_v4 = vmul.f32 1.442695, %v859_v15 }
 0x2d0   : > { %1242 = vpow2.f32 %v855_v24  ;;  %v864_v5 = vmul.f32 1.442695, %v860_v39 }
 0x2d1   : > { %1244 = vpow2.f32 %v857_v41  ;;  %v866_v60 = vmul.f32 1.442695, %v861_v42 }
 0x2d2   : > { %1246 = vpow2.f32 %v862_v4 }
 0x2d3   : > { %1248 = vpow2.f32 %v864_v5 }
 0x2d4   : > { %1250 = vpow2.f32 %v866_v60 }
 0x2d9   : > { %v1241_v8 = vpop.eup %1240 }
 0x2da   : > { %v1243_v0 = vpop.eup %1242 }
 0x2db   : > { %v1245_v62 = vpop.eup %1244 }
 0x2dc   : > { %v1247_v7 = vpop.eup %1246 }
 0x2dd   : > { %v1249_v36 = vpop.eup %1248  ;;  %v868_v12 = vadd.f32 %v1247_v7, %v1241_v8  ;;  %v874_v1 = vsub.f32 %v1241_v8, %v1247_v7 }
 0x2de   : > { %v1251_v17 = vpop.eup %1250  ;;  %v869_v22 = vadd.f32 %v1249_v36, %v1243_v0  ;;  %v875_v23 = vsub.f32 %v1243_v0, %v1249_v36 }
 0x2df   : > { %v870_v28 = vadd.f32 %v1251_v17, %v1245_v62  ;;  %v871_v20 = vmul.f32 0.5, %v868_v12  ;;  %v876_v11 = vsub.f32 %v1245_v62, %v1251_v17  ;;  %v877_v56 = vmul.f32 0.5, %v874_v1 }
 0x2e0   : > { %v872_v14 = vmul.f32 0.5, %v869_v22  ;;  %v878_v27 = vmul.f32 0.5, %v875_v23 }
 0x2e1   : > { %v873_v43 = vmul.f32 0.5, %v870_v28  ;;  %v879_v51 = vmul.f32 0.5, %v876_v11  ;;  %v883_v21 = vrot.slane %v871_v20, %v1414_v40  ;;  %v904_v2 = vmul.f32 %v1235_v25, %v877_v56 }
 0x2e2   : > { %v887_v52 = vrot.slane %v872_v14, %v1414_v40  ;;  %v905_v26 = vmul.f32 %v1237_v47, %v878_v27 }
 0x2e3   : > { %v891_v13 = vrot.slane %v873_v43, %v1414_v40  ;;  %v892_v30 = vmul.f32 %v883_v21, %v1752_v57  ;;  %v895_v31 = vmul.f32 %v883_v21, %v1734_v9  ;;  %v898_v15 = vmul.f32 %v883_v21, %v1770_v16 }
 0x2e4   : > { %v906_v38 = vmul.f32 %v1239_v29, %v879_v51  ;;  %v893_v24 = vmul.f32 %v887_v52, %v1752_v57  ;;  %v896_v39 = vmul.f32 %v887_v52, %v1734_v9  ;;  %v899_v41 = vmul.f32 %v887_v52, %v1770_v16 }
 0x2e5   : > { %v910_v25 = vrot.slane %v904_v2, %v1414_v40  ;;  %v894_v47 = vmul.f32 %v891_v13, %v1752_v57  ;;  %v897_v42 = vmul.f32 %v891_v13, %v1734_v9  ;;  %v914_v4 = vrot.slane %v905_v26, %v1414_v40 }
 0x2e6   : > { %v918_v5 = vrot.slane %v906_v38, %v1414_v40  ;;  %v900_v60 = vmul.f32 %v891_v13, %v1770_v16 }
 0x2e7   : > { %v919_v29 = vmul.f32 %v910_v25, %v1796_v10  ;;  %v922_v8 = vmul.f32 %v910_v25, %v1805_v35  ;;  %v925_v0 = vmul.f32 %v910_v25, %v1816_v61  ;;  %v920_v62 = vmul.f32 %v914_v4, %v1799_v6 }
 0x2e8   : > { %v921_v7 = vmul.f32 %v918_v5, %v1802_v54  ;;  %v923_v57 = vmul.f32 %v914_v4, %v1808_v58  ;;  %v924_v9 = vmul.f32 %v918_v5, %v1811_v19  ;;  %v926_v16 = vmul.f32 %v914_v4, %v1829_v3 }
 0x2e9   : > { %v927_v10 = vmul.f32 %v918_v5, %v1832_v63  ;;  %v928_v35 = vadd.f32 %v919_v29, %v892_v30  ;;  %v931_v36 = vadd.f32 %v922_v8, %v895_v31  ;;  %v929_v61 = vadd.f32 %v920_v62, %v893_v24 }
 0x2ea   : > { %v930_v12 = vadd.f32 %v921_v7, %v894_v47  ;;  %v932_v6 = vadd.f32 %v923_v57, %v896_v39  ;;  %v933_v1 = vadd.f32 %v924_v9, %v897_v42  ;;  %v934_v54 = vadd.f32 %v925_v0, %v898_v15 }
 0x2eb   : > { %v935_v17 = vadd.f32 %v926_v16, %v899_v41  ;;  %v1878_v58 = vadd.f32 %v927_v10, %v900_v60  ;;  %939 = vst [vmem:[%s938_s12] sm:$0xff] %v928_v35  ;;  %942 = vst [vmem:[%s938_s12 + $0x18] sm:$0xff] %v931_v36  ;;  %v948_v19 = vmul.f32 %v928_v35, %v928_v35 }
 0x2ec   : > { %940 = vst [vmem:[%s938_s12 + $0x8] sm:$0xff] %v929_v61  ;;  %941 = vst [vmem:[%s938_s12 + $0x10] sm:$0xff] %v930_v12  ;;  %v949_v3 = vmul.f32 %v929_v61, %v929_v61  ;;  %v950_v22 = vmul.f32 %v930_v12, %v930_v12  ;;  %v1880_v63 = vmul.f32 %v931_v36, %v931_v36 }
 0x2ed   : > { %943 = vst [vmem:[%s938_s12 + $0x20] sm:$0xff] %v932_v6  ;;  %944 = vst [vmem:[%s938_s12 + $0x28] sm:$0xff] %v933_v1  ;;  %v1882_v23 = vmul.f32 %v932_v6, %v932_v6  ;;  %v1885_v28 = vmul.f32 %v933_v1, %v933_v1  ;;  %v960_v20 = vrot.slane %v948_v19, 1  ;;  %v992_v14 = vrot.slane %v948_v19, 5 }
 0x2ee   : > { %945 = vst [vmem:[%s938_s12 + $0x30] sm:$0x1] %v934_v54  ;;  %946 = vst [vmem:[%s938_s12 + $0x38] sm:$0x1] %v935_v17  ;;  %v961_v11 = vrot.slane %v949_v3, 1  ;;  %v962_v56 = vrot.slane %v950_v22, 1  ;;  %v954_v35 = vmul.f32 %v934_v54, %v934_v54  ;;  %v955_v36 = vmul.f32 %v935_v17, %v935_v17 }
 0x2ef   : > { %947 = vst [vmem:[%s938_s12 + $0x40] sm:$0x1] %v1878_v58  ;;  %v993_v27 = vrot.slane %v1880_v63, 5  ;;  %v995_v43 = vrot.slane %v949_v3, 5  ;;  %v996_v51 = vrot.slane %v1882_v23, 5  ;;  %v998_v21 = vrot.slane %v950_v22, 5 }
 0x2f0   : > { %v967_v2 = vsel %vm966_vm3, %v960_v20, 0.0  ;;  %v974_v52 = vsel %vm966_vm3, %v961_v11, 0.0  ;;  %v981_v26 = vsel %vm966_vm3, %v962_v56, 0.0  ;;  %v999_v13 = vrot.slane %v1885_v28, 5 }
 0x2f1   : > { %v968_v30 = vrot.slane %v967_v2, 4  ;;  %v975_v31 = vrot.slane %v974_v52, 4  ;;  %v982_v15 = vrot.slane %v981_v26, 4  ;;  %v994_v38 = vsel %vm991_vm4, %v992_v14, %v993_v27 }
 0x2f2   : > { %v997_v24 = vsel %vm991_vm4, %v995_v43, %v996_v51  ;;  %v1000_v39 = vsel %vm991_vm4, %v998_v21, %v999_v13  ;;  %v1004_v41 = vsel %vm966_vm3, %v994_v38, 0.0  ;;  %v1025_v25 = vrot.slane %v1880_v63, 1 }
 0x2f3   : > { %v969_v47 = vadd.f32 %v968_v30, %v967_v2  ;;  %v976_v42 = vadd.f32 %v975_v31, %v974_v52  ;;  %v983_v4 = vadd.f32 %v982_v15, %v981_v26  ;;  %v1005_v5 = vrot.slane %v1004_v41, 4 }
 0x2f4   : > { %v1011_v60 = vsel %vm966_vm3, %v997_v24, 0.0  ;;  %v1018_v29 = vsel %vm966_vm3, %v1000_v39, 0.0  ;;  %v1026_v8 = vrot.slane %v1882_v23, 1  ;;  %v1031_v16 = vsel %vm966_vm3, %v1025_v25, 0.0 }
 0x2f5   : > { %v970_v0 = vrot.slane %v969_v47, 2  ;;  %v977_v62 = vrot.slane %v976_v42, 2  ;;  %v1006_v7 = vadd.f32 %v1005_v5, %v1004_v41  ;;  %v1012_v57 = vrot.slane %v1011_v60, 4 }
 0x2f6   : > { %v1019_v9 = vrot.slane %v1018_v29, 4  ;;  %v1038_v10 = vsel %vm966_vm3, %v1026_v8, 0.0  ;;  %v984_v61 = vrot.slane %v983_v4, 2  ;;  %v1032_v19 = vrot.slane %v1031_v16, 4 }
 0x2f7   : > { %v1007_v12 = vrot.slane %v1006_v7, 2  ;;  %v1013_v6 = vadd.f32 %v1012_v57, %v1011_v60  ;;  %v1039_v3 = vrot.slane %v1038_v10, 4  ;;  %v971_v22 = vadd.f32 %v970_v0, %v969_v47 }
 0x2f8   : > { %v1020_v1 = vadd.f32 %v1019_v9, %v1018_v29  ;;  %v978_v63 = vadd.f32 %v977_v62, %v976_v42  ;;  %v1027_v20 = vrot.slane %v1885_v28, 1  ;;  %v1033_v14 = vadd.f32 %v1032_v19, %v1031_v16 }
 0x2f9   : > { %v1008_v23 = vadd.f32 %v1007_v12, %v1006_v7  ;;  %v1014_v11 = vrot.slane %v1013_v6, 2  ;;  %v1040_v43 = vadd.f32 %v1039_v3, %v1038_v10  ;;  %v956_v21 = vmul.f32 %v1878_v58, %v1878_v58 }
 0x2fa   : > { %v1021_v56 = vrot.slane %v1020_v1, 2  ;;  %v985_v54 = vadd.f32 %v984_v61, %v983_v4  ;;  %v1034_v2 = vrot.slane %v1033_v14, 2  ;;  %v1045_v26 = vsel %vm966_vm3, %v1027_v20, 0.0 }
 0x2fb   : > { %v1015_v17 = vadd.f32 %v1014_v11, %v1013_v6  ;;  %v1041_v52 = vrot.slane %v1040_v43, 2  ;;  %v1055_v30 = vrot.slane %v954_v35, 5  ;;  %v1057_v31 = vrot.slane %v955_v36, 5 }
 0x2fc   : > { %v972_v15 = vrot.slane %v971_v22, 1  ;;  %v979_v38 = vrot.slane %v978_v63, 1  ;;  %v1009_v24 = vrot.slane %v1008_v23, 1  ;;  %v1022_v39 = vadd.f32 %v1021_v56, %v1020_v1 }
 0x2fd   : > { %v1046_v28 = vrot.slane %v1045_v26, 4  ;;  %v1056_v41 = vsel %vm991_vm4, %v993_v27, %v1055_v30  ;;  %v1058_v25 = vsel %vm991_vm4, %v996_v51, %v1057_v31  ;;  %v1059_v47 = vrot.slane %v956_v21, 5 }
 0x2fe   : > { %v986_v42 = vrot.slane %v985_v54, 1  ;;  %v1016_v58 = vrot.slane %v1015_v17, 1  ;;  %v1035_v4 = vadd.f32 %v1034_v2, %v1033_v14  ;;  %v1042_v5 = vadd.f32 %v1041_v52, %v1040_v43 }
 0x2ff   : > { %v1047_v60 = vadd.f32 %v1046_v28, %v1045_v26  ;;  %v1060_v29 = vsel %vm991_vm4, %v999_v13, %v1059_v47  ;;  %v1064_v8 = vsel %vm966_vm3, %v1056_v41, 0.0  ;;  %v1071_v0 = vsel %vm966_vm3, %v1058_v25, 0.0 }
 0x300   : > { %v973_v62 = vadd.f32 %v972_v15, %v971_v22  ;;  %v1023_v7 = vrot.slane %v1022_v39, 1  ;;  %v1065_v57 = vrot.slane %v1064_v8, 4  ;;  %v1072_v9 = vrot.slane %v1071_v0, 4 }
 0x301   : > { %v980_v16 = vadd.f32 %v979_v38, %v978_v63  ;;  %v1010_v27 = vadd.f32 %v1009_v24, %v1008_v23  ;;  %v1048_v10 = vrot.slane %v1047_v60, 2  ;;  %v1078_v51 = vsel %vm966_vm3, %v1060_v29, 0.0 }
 0x302   : > { %v1017_v35 = vadd.f32 %v1016_v58, %v1015_v17  ;;  %v1066_v36 = vadd.f32 %v1065_v57, %v1064_v8  ;;  %v1073_v61 = vadd.f32 %v1072_v9, %v1071_v0  ;;  %v1079_v12 = vrot.slane %v1078_v51, 4 }
 0x303   : > { %v987_v6 = vadd.f32 %v986_v42, %v985_v54  ;;  %v1036_v1 = vrot.slane %v1035_v4, 1  ;;  %v1043_v13 = vrot.slane %v1042_v5, 1  ;;  %v1049_v19 = vadd.f32 %v1048_v10, %v1047_v60 }
 0x304   : > { %v1024_v3 = vadd.f32 %v1023_v7, %v1022_v39  ;;  %v1067_v20 = vrot.slane %v1066_v36, 2  ;;  %v1074_v11 = vrot.slane %v1073_v61, 2  ;;  %v1080_v22 = vadd.f32 %v1079_v12, %v1078_v51 }
 0x305   : > { %v1050_v56 = vrot.slane %v1049_v19, 1  ;;  %v1085_v63 = vsel %vm44_vm0, %v973_v62, %v1010_v27  ;;  %v1086_v21 = vsel %vm44_vm0, %v980_v16, %v1017_v35  ;;  %v1037_v17 = vadd.f32 %v1036_v1, %v1035_v4 }
 0x306   : > { %v1068_v23 = vadd.f32 %v1067_v20, %v1066_v36  ;;  %v1075_v14 = vadd.f32 %v1074_v11, %v1073_v61  ;;  %v1081_v43 = vrot.slane %v1080_v22, 2  ;;  %v1044_v2 = vadd.f32 %v1043_v13, %v1042_v5 }
 0x307   : > { %v1087_v30 = vsel %vm44_vm0, %v987_v6, %v1024_v3  ;;  %v1051_v31 = vadd.f32 %v1050_v56, %v1049_v19  ;;  %v1089_v15 = vsel %vm1088_vm5, %v1085_v63, %v1037_v17 }
 0x308   : > { %v1069_v52 = vrot.slane %v1068_v23, 1  ;;  %v1076_v54 = vrot.slane %v1075_v14, 1  ;;  %v1082_v26 = vadd.f32 %v1081_v43, %v1080_v22  ;;  %v1090_v38 = vsel %vm1088_vm5, %v1086_v21, %v1044_v2 }
 0x309   : > { %v1091_v41 = vsel %vm1088_vm5, %v1087_v30, %v1051_v31 }
 0x30a   : > { %v1070_v24 = vadd.f32 %v1069_v52, %v1068_v23  ;;  %v1077_v39 = vadd.f32 %v1076_v54, %v1075_v14  ;;  %v1083_v28 = vrot.slane %v1082_v26, 1 }
 0x30c   : > { %v1084_v25 = vadd.f32 %v1083_v28, %v1082_v26  ;;  %v1092_v47 = vsel %vm991_vm4, %v1089_v15, %v1070_v24  ;;  %v1093_v42 = vsel %vm991_vm4, %v1090_v38, %v1077_v39 }
 0x30d   : > { %v1095_v58 = vadd.f32 1.0, %v1092_v47  ;;  %v1096_v4 = vadd.f32 1.0, %v1093_v42 }
 0x30e   : > { %v1094_v5 = vsel %vm991_vm4, %v1091_v41, %v1084_v25 }
 0x30f   : > { %v1097_v60 = vadd.f32 1.0, %v1094_v5  ;;  %1252 = vrsqrt.f32 %v1095_v58  ;;  %vm1100_vm6 = vcmp.eq.f32.partialorder %v1095_v58, inf  ;;  %vm1102_vm7 = vcmp.eq.f32.partialorder %v1095_v58, 0.0 }
 0x310   : > { %1254 = vrsqrt.f32 %v1096_v4  ;;  %v1103_v7 = vand.u32 2147483648, %v1095_v58  ;;  %vm1107_vm8 = vcmp.eq.f32.partialorder %v1096_v4, inf  ;;  %vm1109_vm9 = vcmp.eq.f32.partialorder %v1096_v4, 0.0 }
 0x311   : > { %1256 = vrsqrt.f32 %v1097_v60  ;;  %v1110_v16 = vand.u32 2147483648, %v1096_v4  ;;  %vm1114_vm10 = vcmp.eq.f32.partialorder %v1097_v60, inf  ;;  %v1117_v35 = vand.u32 2147483648, %v1097_v60 }
 0x312   : > { %vm1116_vm11 = vcmp.eq.f32.partialorder %v1097_v60, 0.0 }
 0x319   : > { %v1253_v29 = vpop.eup %1252 }
 0x31a   : > { %v1255_v8 = vpop.eup %1254  ;;  %v1099_v0 = vmul.f32 %v1253_v29, %v1095_v58 }
 0x31b   : > { %v1257_v62 = vpop.eup %1256  ;;  %v1106_v57 = vmul.f32 %v1255_v8, %v1096_v4  ;;  %428 = sbr.rel (!%p426_p0) target bundleno = 506 (0x1fa), region = 50 }
 0x31c   : > { %v1101_v9 = vsel %vm1100_vm6, %v1095_v58, %v1099_v0  ;;  %v1113_v27 = vmul.f32 %v1257_v62, %v1097_v60 }
 0x31d   : > { %v1104_v10 = vsel %vm1102_vm7, %v1103_v7, %v1101_v9  ;;  %v1108_v51 = vsel %vm1107_vm8, %v1096_v4, %v1106_v57 }
 0x31e   : > { %v1111_v36 = vsel %vm1109_vm9, %v1110_v16, %v1108_v51  ;;  %v1115_v61 = vsel %vm1114_vm10, %v1097_v60, %v1113_v27 }
 0x31f   : > { %v1118_v12 = vsel %vm1116_vm11, %v1117_v35, %v1115_v61  ;;  %v1121_v6 = vcombine.low %v1104_v10, %v1111_v36 }
 0x320   : > { %1127 = vst [vmem:[%s1125_s16 + $0x8] sm:$0xf] %v1118_v12 }
 0x321   : > { %1126 = vst [vmem:[%s1125_s16] sm:$0xff] %v1121_v6 }

</bundles_post_ra>
